<compile_context>
chip_gen: v7x
topology: tpu7x:2x2x1
jax: 0.10.0
libtpu: 0.0.40
codegen_flags: <defaults>
</compile_context>

<pallas_src>
import jax
import jax.numpy as jnp
from jax.experimental import pallas as pl
from jax.experimental.pallas import tpu as pltpu


# ----------------------------- Pallas kernels ------------------------------ #
def _dimred_kernel_single_k(x_ref, w_ref, b_ref, o_ref):
    # Single K step: one MXU dot + bias + ReLU straight into the output tile.
    acc = jnp.dot(x_ref[...].astype(jnp.bfloat16),
                  w_ref[...].astype(jnp.bfloat16),
                  preferred_element_type=jnp.float32)
    o_ref[...] = jnp.maximum(acc + b_ref[...], 0.0)


def _dimred_kernel_multi_k(x_ref, w_ref, b_ref, o_ref):
    # K-tiled reduction accumulating directly into the resident f32 output
    # block (its BlockSpec index is k-invariant -> written back to HBM once).
    k = pl.program_id(2)

    @pl.when(k == 0)
    def _():
        o_ref[...] = jnp.zeros_like(o_ref)

    o_ref[...] += jnp.dot(x_ref[...].astype(jnp.bfloat16),
                          w_ref[...].astype(jnp.bfloat16),
                          preferred_element_type=jnp.float32)

    @pl.when(k == pl.num_programs(2) - 1)
    def _():
        o_ref[...] = jnp.maximum(o_ref[...] + b_ref[...], 0.0)


# ------------------------------- wrapper ----------------------------------- #
def _round_up(v, m):
    return ((v + m - 1) // m) * m


def _pad_to(a, shape):
    if tuple(a.shape) == tuple(shape):
        return a
    cfg = [(0, t - s) for s, t in zip(a.shape, shape)]
    return jnp.pad(a, cfg)


def dim_reduction_forward(x, w, b, *, tm=None, tn=None, tk=None):
    """out = relu(x @ w + b); bf16 MXU operands, f32 accumulation/epilogue."""
    n, k_in = x.shape
    k_w, n_out = w.shape
    assert k_in == k_w and b.shape == (1, n_out)

    # --- tile selection -----------------------------------------------------
    # N tile: lane-dense multiple of 128 sized to the output width.
    if tn is None:
        tn = min(_round_up(n_out, 128), 512)
    # K tile: collapse the reduction grid whenever the padded K fits in VMEM.
    if tk is None:
        k_pad128 = _round_up(k_in, 128)
        tk = k_pad128 if k_pad128 <= 2048 else 512
    # M tile: keep >= 2 row blocks when N allows it (v7x has 2 TensorCores that
    # are sharded along "parallel" grid axes).
    if tm is None:
        tm = 512
        while tm > 128 and _round_up(n, 128) < 2 * tm:
            tm //= 2

    mp = _round_up(n, tm)
    kp = _round_up(k_in, tk)
    np_ = _round_up(n_out, tn)
    grid_m, grid_n, grid_k = mp // tm, np_ // tn, kp // tk

    # --- pre-cast only re-read operands; once-read operands cast in-kernel ---
    x_in = x.astype(jnp.bfloat16) if grid_n > 1 else x
    w_in = w.astype(jnp.bfloat16) if grid_m > 1 else w

    xb = _pad_to(x_in, (mp, kp))
    wb = _pad_to(w_in, (kp, np_))
    bb = _pad_to(b.astype(jnp.float32), (1, np_))

    flops = 2 * mp * kp * np_
    bytes_accessed = (xb.size * xb.dtype.itemsize * grid_n     # x re-read per col tile
                      + wb.size * wb.dtype.itemsize * grid_m   # W re-read per row tile
                      + bb.size * 4
                      + mp * np_ * 4)                          # output writeback

    if grid_k == 1:
        kernel = _dimred_kernel_single_k
        grid = (grid_m, grid_n)
        in_specs = [
            pl.BlockSpec((tm, tk), lambda i, j: (i, 0)),   # x tile
            pl.BlockSpec((tk, tn), lambda i, j: (0, j)),   # W tile
            pl.BlockSpec((1, tn), lambda i, j: (0, j)),    # bias row
        ]
        out_spec = pl.BlockSpec((tm, tn), lambda i, j: (i, j))
        dims = ("parallel", "parallel")
    else:
        kernel = _dimred_kernel_multi_k
        grid = (grid_m, grid_n, grid_k)                    # reduction axis last
        in_specs = [
            pl.BlockSpec((tm, tk), lambda i, j, k: (i, k)),
            pl.BlockSpec((tk, tn), lambda i, j, k: (k, j)),
            pl.BlockSpec((1, tn), lambda i, j, k: (0, j)),
        ]
        out_spec = pl.BlockSpec((tm, tn), lambda i, j, k: (i, j))
        dims = ("parallel", "parallel", "arbitrary")

    out = pl.pallas_call(
        kernel,
        out_shape=jax.ShapeDtypeStruct((mp, np_), jnp.float32),
        grid_spec=pltpu.PrefetchScalarGridSpec(
            num_scalar_prefetch=0,
            grid=grid,
            in_specs=in_specs,
            out_specs=out_spec,
        ),
        compiler_params=pltpu.CompilerParams(dimension_semantics=dims),
        cost_estimate=pl.CostEstimate(
            flops=flops, transcendentals=0, bytes_accessed=bytes_accessed),
    )(xb, wb, bb)

    # Strip padding only if it was introduced (avoids an extra HBM copy pass).
    if (mp, np_) != (n, n_out):
        out = out[:n, :n_out]
    return out


# --------------------------------- main ------------------------------------ #
if __name__ == "__main__":
    key = jax.random.PRNGKey(0)
    kx, kw, kb = jax.random.split(key, 3)

    # Shapes consistent with DimReduction(in_features, out_features).
    n, in_features, out_features = 512, 512, 256
    x = jax.random.normal(kx, (n, in_features), dtype=jnp.float32)
    lim = 1.0 / (in_features ** 0.5)  # nn.Linear default init range
    w = jax.random.uniform(kw, (in_features, out_features), jnp.float32, -lim, lim)
    b = jax.random.uniform(kb, (1, out_features), jnp.float32, -lim, lim)

    out = dim_reduction_forward(x, w, b)
    jax.block_until_ready(out)
    assert out.shape == (n, out_features)

    # Reference with the same bf16 operand rounding as the kernel's MXU path.
    ref_bf16 = jnp.maximum(
        jnp.dot(x.astype(jnp.bfloat16), w.astype(jnp.bfloat16),
                preferred_element_type=jnp.float32) + b, 0.0)
    # Full-precision module semantics (looser tolerance covers bf16 rounding).
    ref_f32 = jnp.maximum(x @ w + b, 0.0)
    assert jnp.allclose(out, ref_bf16, atol=1e-4, rtol=1e-4)
    assert jnp.allclose(out, ref_f32, atol=5e-2, rtol=5e-2)

    # Ragged case exercises the padding + output-slice path.
    n2, inf2, outf2 = 100, 200, 30
    x2 = jax.random.normal(kx, (n2, inf2), dtype=jnp.float32)
    lim2 = 1.0 / (inf2 ** 0.5)
    w2 = jax.random.uniform(kw, (inf2, outf2), jnp.float32, -lim2, lim2)
    b2 = jax.random.uniform(kb, (1, outf2), jnp.float32, -lim2, lim2)
    out2 = dim_reduction_forward(x2, w2, b2)
    jax.block_until_ready(out2)
    assert out2.shape == (n2, outf2)
    ref2 = jnp.maximum(x2 @ w2 + b2, 0.0)
    assert jnp.allclose(out2, ref2, atol=5e-2, rtol=5e-2)

    print("KERNEL_OK")
</pallas_src>

<mosaic_0001>
module attributes {stable_mosaic.version = 11 : i64} {
  func.func @_dimred_kernel_single_k(%arg0: i32, %arg1: i32, %arg2: memref<256x512xf32, #tpu.memory_space<vmem>>, %arg3: memref<512x256xbf16, #tpu.memory_space<vmem>>, %arg4: memref<1x256xf32, #tpu.memory_space<vmem>>, %arg5: memref<256x256xf32, #tpu.memory_space<vmem>>) attributes {dimension_semantics = [#tpu.dimension_semantics<parallel>, #tpu.dimension_semantics<parallel>], iteration_bounds = array<i64: 2, 1>, scalar_prefetch = 0 : i64, scratch_operands = 0 : i64, tpu.core_type = #tpu.core_type<tc>, window_params = [{transform_indices = @transform_0, window_bounds = array<i64: 256, 512>}, {transform_indices = @transform_1, window_bounds = array<i64: 512, 256>}, {transform_indices = @transform_2, window_bounds = array<i64: 1, 256>}, {transform_indices = @transform_3, window_bounds = array<i64: 256, 256>}]} {
    %c0 = arith.constant 0 : index
    %c0_0 = arith.constant 0 : index
    %0 = vector.load %arg2[%c0, %c0_0] : memref<256x512xf32, #tpu.memory_space<vmem>>, vector<256x512xf32>
    %1 = arith.truncf %0 : vector<256x512xf32> to vector<256x512xbf16>
    %c0_1 = arith.constant 0 : index
    %c0_2 = arith.constant 0 : index
    %2 = vector.load %arg3[%c0_1, %c0_2] : memref<512x256xbf16, #tpu.memory_space<vmem>>, vector<512x256xbf16>
    %cst = arith.constant dense<0.000000e+00> : vector<256x256xf32>
    %3 = tpu.matmul %1, %2, %cst {dimension_numbers = #tpu.dot_dimension_numbers<[1], [0], [0], [1], [0, 0, 1, 1], [], []>} : vector<256x512xbf16>, vector<512x256xbf16>, vector<256x256xf32> -> vector<256x256xf32>
    %c0_3 = arith.constant 0 : index
    %c0_4 = arith.constant 0 : index
    %4 = vector.load %arg4[%c0_3, %c0_4] : memref<1x256xf32, #tpu.memory_space<vmem>>, vector<1x256xf32>
    %5 = vector.broadcast %4 : vector<1x256xf32> to vector<256x256xf32>
    %6 = arith.addf %3, %5 : vector<256x256xf32>
    %cst_5 = arith.constant 0.000000e+00 : f32
    %7 = vector.broadcast %cst_5 : f32 to vector<256x256xf32>
    %8 = arith.maximumf %6, %7 : vector<256x256xf32>
    %c0_6 = arith.constant 0 : index
    %c0_7 = arith.constant 0 : index
    %9 = vector.load %arg5[%c0_6, %c0_7] : memref<256x256xf32, #tpu.memory_space<vmem>>, vector<256x256xf32>
    tpu.vector_store %arg5[%c0_6, %c0_7], %8 {strides = array<i32>} : memref<256x256xf32, #tpu.memory_space<vmem>>, vector<256x256xf32>,
    return
  }
  func.func @transform_0(%arg0: i32, %arg1: i32) -> (i32, i32) {
    %c0_i32 = arith.constant 0 : i32
    %c0_i32_0 = arith.constant 0 : i32
    return %arg0, %c0_i32 : i32, i32
  }
  func.func @transform_1(%arg0: i32, %arg1: i32) -> (i32, i32) {
    %c0_i32 = arith.constant 0 : i32
    %c0_i32_0 = arith.constant 0 : i32
    return %c0_i32, %arg1 : i32, i32
  }
  func.func @transform_2(%arg0: i32, %arg1: i32) -> (i32, i32) {
    %c0_i32 = arith.constant 0 : i32
    %c0_i32_0 = arith.constant 0 : i32
    return %c0_i32, %arg1 : i32, i32
  }
  func.func @transform_3(%arg0: i32, %arg1: i32) -> (i32, i32) {
    %c0_i32 = arith.constant 0 : i32
    return %arg0, %arg1 : i32, i32
  }
}

</mosaic_0001>

<bundles_post_ra>
// kernel: tpu_custom_call.1
= control target key start
LH: loop header
LB: loop body
LE: loop exit
PB: predicated region body
PF: predicated region fallthrough
CT: control target
= control target key end

     0   :  { %8 = vsyncpa [#allocation3], 0  ;;  %s2531_s0 = inlined_call_operand.hbm [shape: f32[512,512], index: 0, kind: input, shape index: {}]   ;;  %s2532_s1 = inlined_call_operand.hbm [shape: bf16[512,256], index: 1, kind: input, shape index: {}]   ;;  %s2533_s2 = inlined_call_operand.vmem [shape: f32[1,256], index: 2, kind: input, shape index: {}]   ;;  %s2534_s3 = inlined_call_operand.hbm [shape: f32[512,256], index: 3, kind: output, shape index: {}]  }
   0x1   :  { %10 = vsyncpa [#allocation3 + $0x1], 0 }
   0x2   :  { %11 = vsyncpa [#allocation6], 0 }
   0x3   :  { %12 = vsyncpa [#allocation4], 0 }
   0x4   :  { %14 = vsyncpa [#allocation4 + $0x1], 0  ;;  %s2043_s12 = smov 0   ;;  %s2045_s13 = smov 0  }
   0x5   :  { %s2047_s14 = smov 0   ;;  %s2049_s15 = smov 0  }
   0x6   :  { %s2051_s16 = smov 0   ;;  %s2053_s17 = smov 0  }
   0x7 LB: > { %s1477_s18 = sadd.s32 4294967295, %s2012_s17   ;;  %s1478_s19 = sadd.s32 4294967294, %s2012_s17   ;;  %s2012_s17 = sphi %s2053_s17, %s20_s17   ;;  %s2008_s16 = sphi %s2051_s16, %s2558_s16   ;;  %s2004_s15 = sphi %s2049_s15, %s2557_s15   ;;  %s2000_s14 = sphi %s2047_s14, %s2556_s14   ;;  %s1996_s13 = sphi %s2045_s13, %s2555_s13   ;;  %s1992_s12 = sphi %s2043_s12, %s2554_s12  }
   0x8   : > { %p52_p0 = scmp.ne.s32.totalorder %s1996_s13, %s1992_s12  ;;  %p2077_p1 = scmp.eq.s32.totalorder %s1477_s18, 0 }
   0x9   : > { %p2081_p2 = scmp.eq.s32.totalorder %s1477_s18, 1  ;;  %p136_p3 = scmp.eq.s32.totalorder %s1478_s19, 1 }
   0xa   : > { %s2539_s20 = scalar_select %p2077_p1, 1, 0 }
   0xb   : > { %s2540_s21 = scalar_select %p2081_p2, 1, 0 }
   0xc   : > { %p2087_p4 = por %p2077_p1, %p52_p0  ;;  %p1479_p5 = scmp.ge.s32.totalorder %s2012_s17, 1 }
   0xd   : > { %p2092_p6 = por %p136_p3, %p52_p0  ;;  %p143_p7 = scmp.lt.s32.totalorder %s2012_s17, 3 }
   0xe   : > { %s2541_s22 = scalar_select %p2087_p4, 1, 0 }
   0xf   : > { %s2542_s23 = scalar_select %p2092_p6, 1, 0 }
  0x10   : > { %p2097_p8 = pnand %p1479_p5, %p143_p7  ;;  %s2014_s25 = smov [#allocation5]  }
  0x11   : > { %s158_s26 = sshll.u32 %s2014_s25, 4  ;;  %s32_s28 = sadd.s32 1, %s2008_s16  ;;  %s159_s26 = int_to_ptr.vmem [resolvable:$true] %s158_s26 }
  0x12   : > { %s2543_s24 = scalar_select %p2097_p8, 1, 0 }
  0x13   : > { %p1701_p9 = pneg %p2097_p8  ;;  %s1868_s4 = scalar_lea.hbm %s2532_s1, 8192 }
  0x14   : > { %p1869_p12 = scmp.ne.s32.totalorder %s2532_s1, %s1868_s4  ;;  %p1875_p5 = scmp.lt.u32.totalorder %s1868_s4, %s2532_s1 }
  0x15   : > { %p2106_p11 = pnand %p1701_p9, %p2077_p1 }
  0x17   : > { %p1870_p13 = pneg %p2106_p11 }
  0x19   : > { %p1871_p0 = pnand %p1870_p13, %p1869_p12 }
  0x1b   : > { %p1872_p3 = pneg %p1871_p0 }
  0x1d   : > { %p1877_p7 = pnand %p1875_p5, %p1872_p3 }
  0x1f   : > { %1880 = shalt.err (!%p1877_p7)
}
  0x20   : > { %s1881_s9 = scalar_lea.vmem %s159_s26, 8192  ;;  %p1889_p1 = scmp.lt.s32.totalorder %s159_s26, %s159_s26 }
  0x21   : > { %p1882_p9 = scmp.ne.s32.totalorder %s159_s26, %s1881_s9  ;;  %p1890_p4 = scmp.lt.s32.totalorder %s1881_s9, %s1881_s9 }
  0x23   : > { %p1884_p10 = pnand %p1882_p9, %p1870_p13  ;;  %p1891_p8 = por %p1890_p4, %p1889_p1 }
  0x25   : > { %p1885_p6 = pneg %p1884_p10 }
  0x27   : > { %p1892_p2 = pnand %p1891_p8, %p1885_p6 }
  0x29   : > { %1895 = shalt.err (!%p1892_p2)
}
  0x2a   : > { %s2015_s10 = smov 128   ;;  %s2016_s11 = smov 8  }
  0x2b   : > { %1704 = dma.hbm_to_vmem [thread:$0]  (!%p2106_p11), %s2532_s1, 8192, %s159_s26, [#allocation6], %s2015_s10, %s2015_s10, %s2016_s11  }
  0x2c   : > { %p34_p1 = scmp.ge.s32.totalorder %s32_s28, 2  ;;  %s39_s25 = sadd.s32 1, %s2000_s14 }
  0x2d   : > { %p46_p2 = scmp.ne.s32.totalorder %s2000_s14, %s1996_s13  ;;  %p47_p4 = scmp.eq.s32.totalorder %s2012_s17, 0 }
  0x2e   : > { %s2560_s28 = smov (%p34_p1, %s32_s28), 0  ;;  %p2546_p8 = scmp.ne.s32.totalorder %s2540_s21, 0 }
  0x2f   : > { %p2133_p6 = por %p47_p4, %p46_p2  ;;  %s36_s27 = ssub.s32 %s2008_s16, %s2560_s28 }
  0x30   : > { %p2139_p10 = por %p2546_p8, %p46_p2  ;;  %p1714_p12 = scmp.lt.s32.totalorder %s2012_s17, 2 }
  0x31   : > { %p37_p11 = scmp.eq.s32.totalorder %s36_s27, 0  ;;  %s180_s26 = sand.u32 1, %s2000_s14  }
  0x32   : > { %s1483_s4 = sshll.u32 %s180_s26, 10  ;;  %s1562_s6 = sshll.u32 %s2008_s16, 14 }
  0x33   : > { %s2148_s5 = scalar_select %p37_p11, %s2000_s14, %s39_s25  }
  0x34   : > { %s2154_s9 = scalar_lea.hbm %s2531_s0, %s1562_s6  ;;  %s184_s21 = scalar_lea.vmem [#allocation2], %s1483_s4 }
  0x35   : > { %s192_s10 = sshll.u32 %s184_s21, 4  ;;  %p2160_p13 = pnand %p1714_p12, %p2133_p6  ;;  %s2156_s10 = int_to_ptr.vmem [resolvable:$true] %s192_s10 }
  0x36   : > { %s2164_s18 = scalar_lea.sflag [#allocation3], %s180_s26  ;;  %s1896_s19 = scalar_lea.hbm %s2154_s9, 16384 }
  0x37   : > { %p1897_p0 = scmp.ne.s32.totalorder %s2154_s9, %s1896_s19  ;;  %p1898_p3 = pneg %p2160_p13 }
  0x38   : > { %s1901_s29 = scalar_lea.hbm %s2531_s0, 32768  ;;  %p1902_p9 = scmp.lt.u32.totalorder %s2154_s9, %s2531_s0 }
  0x39   : > { %p1899_p5 = pnand %p1898_p3, %p1897_p0  ;;  %p1903_p1 = scmp.lt.u32.totalorder %s1901_s29, %s1896_s19 }
  0x3a   : > { %p1905_p4 = scmp.lt.u32.totalorder %s1896_s19, %s2154_s9 }
  0x3b   : > { %p1900_p7 = pneg %p1899_p5  ;;  %p1904_p2 = por %p1903_p1, %p1902_p9 }
  0x3d   : > { %p1906_p6 = por %p1905_p4, %p1904_p2 }
  0x3f   : > { %p1907_p8 = pnand %p1906_p6, %p1900_p7 }
  0x41   : > { %1910 = shalt.err (!%p1907_p8)
}
  0x42   : > { %s1911_s26 = scalar_lea.vmem %s2156_s10, 16384  ;;  %s2017_s7 = smov [#allocation2]  }
  0x43   : > { %p1912_p12 = scmp.ne.s32.totalorder %s2156_s10, %s1911_s26  ;;  %s1916_s8 = sshll.u32 %s2017_s7, 4  ;;  %s1917_s8 = int_to_ptr.vmem [resolvable:$false] %s1916_s8 }
  0x44   : > { %s1918_s21 = scalar_lea.vmem %s1917_s8, 32768  ;;  %p1919_p5 = scmp.lt.s32.totalorder %s2156_s10, %s1917_s8 }
  0x45   : > { %p1914_p11 = pnand %p1912_p12, %p1898_p3  ;;  %p1920_p9 = scmp.lt.s32.totalorder %s1918_s21, %s1911_s26 }
  0x47   : > { %p1915_p0 = pneg %p1914_p11  ;;  %p1921_p1 = por %p1920_p9, %p1919_p5 }
  0x49   : > { %p1922_p2 = pnand %p1921_p1, %p1915_p0 }
  0x4b   : > { %1925 = shalt.err (!%p1922_p2)
}
  0x4c   : > { %s2018_s19 = smov 512   ;;  %s2019_s25 = smov 32  }
  0x4d   : > { %1708 = dma.hbm_to_vmem [thread:$0]  (!%p2160_p13), %s2154_s9, 16384, %s2156_s10, %s2164_s18, %s2018_s19, %s2018_s19, %s2019_s25  }
  0x4e   : > { %p2549_p3 = scmp.ne.s32.totalorder %s2543_s24, 0 }
  0x4f   : > { %s2195_s27 = sand.u32 (!%p2549_p3), 1, %s1996_s13   ;;  %p2550_p7 = scmp.ne.s32.totalorder (!%p2549_p3), %s2541_s22, 0 }
  0x50   : > { %204 = sbr.rel (%p2549_p3) target bundleno = 512 (0x200), region = 32  ;;  %s1488_s29 = sshll.u32 (!%p2549_p3), %s2195_s27, 10 }
  0x51   : > { %s207_s4 = scalar_lea.sflag (!%p2549_p3), [#allocation3], %s2195_s27  ;;  %s2199_s6 = scalar_lea.vmem (!%p2549_p3), [#allocation2], %s1488_s29 }
  0x57   : > { %1979 = dma.done.wait (%p2550_p7), %s207_s4, 16384  }
  0x58   : > { %1981 = vsyncadd (%p2550_p7), %s207_s4, 4294950912  ;;  %p2551_p13 = scmp.ne.s32.totalorder %s2539_s20, 0 }
  0x5a   : > { %1983 = dma.done.wait (%p2551_p13), [#allocation6], 8192  }
  0x5b   : > { %1985 = vsyncadd (%p2551_p13), [#allocation6], 4294959104  ;;  %v1772_v0 = vld [vmem:[#allocation5 + $0x4] ss:$8 sps:$4 sm:$0xff]   ;;  %v1776_v2 = vld [vmem:[#allocation5] ss:$8 sps:$4 sm:$0xff]  }
  0x5c   : > { %v1774_v1 = vld [vmem:[#allocation5 + $0x104] ss:$8 sps:$4 sm:$0xff]   ;;  %838 = vmatprep.subr.bf16.mxu1 %v1772_v0  ;;  %v1777_v3 = vld [vmem:[#allocation5 + $0x100] ss:$8 sps:$4 sm:$0xff]   ;;  %v1778_v4 = vld [vmem:[#allocation5 + $0x14] ss:$8 sps:$4 sm:$0xff]  }
  0x5d   : > { %1031 = vmatprep.subr.bf16.mxu0 %v1774_v1  ;;  %839 = vmatpush1.bf16.msra.mxu1 %v1776_v2  ;;  %v1780_v5 = vld [vmem:[#allocation5 + $0x114] ss:$8 sps:$4 sm:$0xff]   ;;  %v1782_v6 = vld [vmem:[#allocation5 + $0x10] ss:$8 sps:$4 sm:$0xff]   ;;  %v1784_v8 = vld [vmem:[#allocation5 + $0x24] ss:$8 sps:$4 sm:$0xff]  }
  0x5e   : > { %1032 = vmatpush1.bf16.msra.mxu0 %v1777_v3  ;;  %840 = vmatprep.subr.bf16.mxu1 %v1778_v4  ;;  %v1783_v7 = vld [vmem:[#allocation5 + $0x110] ss:$8 sps:$4 sm:$0xff]   ;;  %v1786_v9 = vld [vmem:[#allocation5 + $0x124] ss:$8 sps:$4 sm:$0xff]   ;;  %v1788_v10 = vld [vmem:[#allocation5 + $0x20] ss:$8 sps:$4 sm:$0xff]  }
  0x5f   : > { %1033 = vmatprep.subr.bf16.mxu0 %v1780_v5  ;;  %v1789_v11 = vld [vmem:[#allocation5 + $0x120] ss:$8 sps:$4 sm:$0xff]   ;;  %v1790_v12 = vld [vmem:[#allocation5 + $0x34] ss:$8 sps:$4 sm:$0xff]   ;;  %v1794_v14 = vld [vmem:[#allocation5 + $0x30] ss:$8 sps:$4 sm:$0xff]  }
  0x60   : > { %v1792_v13 = vld [vmem:[#allocation5 + $0x134] ss:$8 sps:$4 sm:$0xff]   ;;  %v1795_v15 = vld [vmem:[#allocation5 + $0x130] ss:$8 sps:$4 sm:$0xff]   ;;  %v1796_v16 = vld [vmem:[#allocation5 + $0x44] ss:$8 sps:$4 sm:$0xff]  }
  0x61   : > { %841 = vmatpush1.bf16.msra.mxu1 %v1782_v6  ;;  %v1798_v17 = vld [vmem:[#allocation5 + $0x144] ss:$8 sps:$4 sm:$0xff]   ;;  %v1800_v18 = vld [vmem:[#allocation5 + $0x40] ss:$8 sps:$4 sm:$0xff]   ;;  %v1802_v20 = vld [vmem:[#allocation5 + $0x54] ss:$8 sps:$4 sm:$0xff]  }
  0x62   : > { %1034 = vmatpush1.bf16.msra.mxu0 %v1783_v7  ;;  %842 = vmatprep.subr.bf16.mxu1 %v1784_v8  ;;  %v1801_v19 = vld [vmem:[#allocation5 + $0x140] ss:$8 sps:$4 sm:$0xff]   ;;  %v1804_v21 = vld [vmem:[#allocation5 + $0x154] ss:$8 sps:$4 sm:$0xff]   ;;  %v1806_v22 = vld [vmem:[#allocation5 + $0x50] ss:$8 sps:$4 sm:$0xff]  }
  0x63   : > { %1035 = vmatprep.subr.bf16.mxu0 %v1786_v9  ;;  %v1807_v23 = vld [vmem:[#allocation5 + $0x150] ss:$8 sps:$4 sm:$0xff]   ;;  %v1808_v24 = vld [vmem:[#allocation5 + $0x64] ss:$8 sps:$4 sm:$0xff]   ;;  %v1812_v26 = vld [vmem:[#allocation5 + $0x60] ss:$8 sps:$4 sm:$0xff]  }
  0x64   : > { %v1810_v25 = vld [vmem:[#allocation5 + $0x164] ss:$8 sps:$4 sm:$0xff]   ;;  %v1813_v27 = vld [vmem:[#allocation5 + $0x160] ss:$8 sps:$4 sm:$0xff]   ;;  %v1814_v28 = vld [vmem:[#allocation5 + $0x74] ss:$8 sps:$4 sm:$0xff]  }
  0x65   : > { %843 = vmatpush1.bf16.msra.mxu1 %v1788_v10  ;;  %v1816_v29 = vld [vmem:[#allocation5 + $0x174] ss:$8 sps:$4 sm:$0xff]   ;;  %v1818_v30 = vld [vmem:[#allocation5 + $0x70] ss:$8 sps:$4 sm:$0xff]   ;;  %v1820_v32 = vld [vmem:[#allocation5 + $0x84] ss:$8 sps:$4 sm:$0xff]  }
  0x66   : > { %1036 = vmatpush1.bf16.msra.mxu0 %v1789_v11  ;;  %844 = vmatprep.subr.bf16.mxu1 %v1790_v12  ;;  %v1819_v31 = vld [vmem:[#allocation5 + $0x170] ss:$8 sps:$4 sm:$0xff]   ;;  %v1822_v33 = vld [vmem:[#allocation5 + $0x184] ss:$8 sps:$4 sm:$0xff]   ;;  %v1824_v34 = vld [vmem:[#allocation5 + $0x80] ss:$8 sps:$4 sm:$0xff]  }
  0x67   : > { %1037 = vmatprep.subr.bf16.mxu0 %v1792_v13  ;;  %v1825_v35 = vld [vmem:[#allocation5 + $0x180] ss:$8 sps:$4 sm:$0xff]   ;;  %v1826_v36 = vld [vmem:[#allocation5 + $0x94] ss:$8 sps:$4 sm:$0xff]   ;;  %v1830_v38 = vld [vmem:[#allocation5 + $0x90] ss:$8 sps:$4 sm:$0xff]  }
  0x68   : > { %v1828_v37 = vld [vmem:[#allocation5 + $0x194] ss:$8 sps:$4 sm:$0xff]   ;;  %v1831_v39 = vld [vmem:[#allocation5 + $0x190] ss:$8 sps:$4 sm:$0xff]   ;;  %v1832_v40 = vld [vmem:[#allocation5 + $0xa4] ss:$8 sps:$4 sm:$0xff]  }
  0x69   : > { %845 = vmatpush1.bf16.msra.mxu1 %v1794_v14  ;;  %v1834_v41 = vld [vmem:[#allocation5 + $0x1a4] ss:$8 sps:$4 sm:$0xff]   ;;  %v1836_v42 = vld [vmem:[#allocation5 + $0xa0] ss:$8 sps:$4 sm:$0xff]   ;;  %v1838_v44 = vld [vmem:[#allocation5 + $0xb4] ss:$8 sps:$4 sm:$0xff]  }
  0x6a   : > { %1038 = vmatpush1.bf16.msra.mxu0 %v1795_v15  ;;  %846 = vmatprep.subr.bf16.mxu1 %v1796_v16  ;;  %v1837_v43 = vld [vmem:[#allocation5 + $0x1a0] ss:$8 sps:$4 sm:$0xff]   ;;  %v1840_v45 = vld [vmem:[#allocation5 + $0x1b4] ss:$8 sps:$4 sm:$0xff]   ;;  %v1842_v50 = vld [vmem:[#allocation5 + $0xb0] ss:$8 sps:$4 sm:$0xff]  }
  0x6b   : > { %1039 = vmatprep.subr.bf16.mxu0 %v1798_v17  ;;  %v251_v46 = vld [vmem:[%s2199_s6 + $0x8] sm:$0xff]  ;;  %v253_v48 = vld [vmem:[%s2199_s6 + $0x18] sm:$0xff]  ;;  %v250_v6 = vld [vmem:[%s2199_s6] sm:$0xff]  ;;  %s1490_s24 = sshll.u32 %s2195_s27, 9  ;;  %s1564_s10 = sshll.u32 %s2004_s15, 13 }
  0x6c   : > { %v255_v47 = vld [vmem:[%s2199_s6 + $0x28] sm:$0xff]  ;;  %v257_v49 = vld [vmem:[%s2199_s6 + $0x38] sm:$0xff]  ;;  %v254_v7 = vld [vmem:[%s2199_s6 + $0x20] sm:$0xff]  ;;  %s2349_s9 = scalar_lea.vmem [#allocation7], %s1490_s24  ;;  %s2477_s7 = scalar_lea.hbm %s2534_s3, %s1564_s10 }
  0x6d   : > { %847 = vmatpush1.bf16.msra.mxu1 %v1800_v18  ;;  %v1843_v51 = vld [vmem:[#allocation5 + $0x1b0] ss:$8 sps:$4 sm:$0xff]   ;;  %v379_v52 = vpack.c.bf16 %v255_v47, %v251_v46  ;;  %v381_v53 = vpack.c.bf16 %v257_v49, %v253_v48  ;;  %v1844_v54 = vld [vmem:[#allocation5 + $0xc4] ss:$8 sps:$4 sm:$0xff]   ;;  %v1848_v56 = vld [vmem:[#allocation5 + $0xc0] ss:$8 sps:$4 sm:$0xff]   ;;  %v378_v14 = vpack.c.bf16 %v254_v7, %v250_v6 }
  0x6e   : > { %1040 = vmatpush1.bf16.msra.mxu0 %v1801_v19  ;;  %848 = vmatprep.subr.bf16.mxu1 %v1802_v20  ;;  %v1846_v55 = vld [vmem:[#allocation5 + $0x1c4] ss:$8 sps:$4 sm:$0xff]   ;;  %v1849_v57 = vld [vmem:[#allocation5 + $0x1c0] ss:$8 sps:$4 sm:$0xff]   ;;  %v1850_v58 = vld [vmem:[#allocation5 + $0xd4] ss:$8 sps:$4 sm:$0xff]  }
  0x6f   : > { %1041 = vmatprep.subr.bf16.mxu0 %v1804_v21  ;;  %870 = vmatprep.mubr.bf16.mxu1 %v379_v52  ;;  %v1852_v59 = vld [vmem:[#allocation5 + $0x1d4] ss:$8 sps:$4 sm:$0xff]   ;;  %v1854_v60 = vld [vmem:[#allocation5 + $0xd0] ss:$8 sps:$4 sm:$0xff]   ;;  %v1856_v62 = vld [vmem:[#allocation5 + $0xe4] ss:$8 sps:$4 sm:$0xff]  }
  0x70   : > { %1063 = vmatprep.mubr.bf16.mxu0 %v381_v53  ;;  %v1855_v61 = vld [vmem:[#allocation5 + $0x1d0] ss:$8 sps:$4 sm:$0xff]   ;;  %v1858_v63 = vld [vmem:[#allocation5 + $0x1e4] ss:$8 sps:$4 sm:$0xff]   ;;  %v1860_v0 = vld [vmem:[#allocation5 + $0xe0] ss:$8 sps:$4 sm:$0xff]  }
  0x71   : > { %849 = vmatpush1.bf16.msra.mxu1 %v1806_v22  ;;  %v1861_v1 = vld [vmem:[#allocation5 + $0x1e0] ss:$8 sps:$4 sm:$0xff]   ;;  %v1862_v2 = vld [vmem:[#allocation5 + $0xf4] ss:$8 sps:$4 sm:$0xff]   ;;  %v1866_v4 = vld [vmem:[#allocation5 + $0xf0] ss:$8 sps:$4 sm:$0xff]  }
  0x72   : > { %1042 = vmatpush1.bf16.msra.mxu0 %v1807_v23  ;;  %850 = vmatprep.subr.bf16.mxu1 %v1808_v24  ;;  %v1864_v3 = vld [vmem:[#allocation5 + $0x1f4] ss:$8 sps:$4 sm:$0xff]   ;;  %v1867_v5 = vld [vmem:[#allocation5 + $0x1f0] ss:$8 sps:$4 sm:$0xff]   ;;  %v259_v10 = vld [vmem:[%s2199_s6 + $0x48] sm:$0xff]  ;;  %s1369_s11 = sshll.u32 %s2349_s9, 4  ;;  %s2479_s11 = int_to_ptr.vmem [resolvable:$true] %s1369_s11 }
  0x73   : > { %1043 = vmatprep.subr.bf16.mxu0 %v1810_v25  ;;  %v252_v8 = vld [vmem:[%s2199_s6 + $0x10] sm:$0xff]  ;;  %v263_v11 = vld [vmem:[%s2199_s6 + $0x68] sm:$0xff]  ;;  %v261_v12 = vld [vmem:[%s2199_s6 + $0x58] sm:$0xff]  ;;  %s1353_s15 = scalar_lea.sflag [#allocation4], %s2195_s27  ;;  %s1926_s8 = scalar_lea.vmem %s2479_s11, 8192 }
  0x74   : > { %v256_v9 = vld [vmem:[%s2199_s6 + $0x30] sm:$0xff]  ;;  %v265_v13 = vld [vmem:[%s2199_s6 + $0x78] sm:$0xff]  ;;  %v383_v16 = vpack.c.bf16 %v263_v11, %v259_v10  ;;  %v258_v18 = vld [vmem:[%s2199_s6 + $0x40] sm:$0xff]  ;;  %p1927_p4 = scmp.ne.s32.totalorder %s2479_s11, %s1926_s8  ;;  %s2020_s21 = smov [#allocation7]  }
  0x75   : > { %851 = vmatpush1.bf16.msra.mxu1 %v1812_v26  ;;  %v380_v15 = vpack.c.bf16 %v256_v9, %v252_v8  ;;  %v385_v17 = vpack.c.bf16 %v265_v13, %v261_v12  ;;  %v262_v19 = vld [vmem:[%s2199_s6 + $0x60] sm:$0xff]  ;;  %v260_v20 = vld [vmem:[%s2199_s6 + $0x50] sm:$0xff]  ;;  %v267_v22 = vld [vmem:[%s2199_s6 + $0x88] sm:$0xff]  ;;  %s1930_s19 = sshll.u32 %s2020_s21, 4  ;;  %s1931_s19 = int_to_ptr.vmem [resolvable:$false] %s1930_s19 }
  0x76   : > { %1044 = vmatpush1.bf16.msra.mxu0 %v1813_v27  ;;  %852 = vmatprep.subr.bf16.mxu1 %v1814_v28  ;;  %v264_v21 = vld [vmem:[%s2199_s6 + $0x70] sm:$0xff]  ;;  %v271_v23 = vld [vmem:[%s2199_s6 + $0xa8] sm:$0xff]  ;;  %v269_v24 = vld [vmem:[%s2199_s6 + $0x98] sm:$0xff]  ;;  %v382_v26 = vpack.c.bf16 %v262_v19, %v258_v18  ;;  %p1928_p6 = pnand %p1927_p4, %p2139_p10  ;;  %s1932_s25 = scalar_lea.vmem %s1931_s19, 16384 }
  0x77   : > { %1045 = vmatprep.subr.bf16.mxu0 %v1816_v29  ;;  %v273_v25 = vld [vmem:[%s2199_s6 + $0xb8] sm:$0xff]  ;;  %v384_v27 = vpack.c.bf16 %v264_v21, %v260_v20  ;;  %v387_v28 = vpack.c.bf16 %v271_v23, %v267_v22  ;;  %v283_v46 = vld [vmem:[%s2199_s6 + $0x108] sm:$0xff]  ;;  %p1933_p12 = scmp.lt.s32.totalorder %s2479_s11, %s1931_s19  ;;  %p1934_p11 = scmp.lt.s32.totalorder %s1932_s25, %s1926_s8 }
  0x78   : > { %v389_v29 = vpack.c.bf16 %v273_v25, %v269_v24  ;;  %v287_v47 = vld [vmem:[%s2199_s6 + $0x128] sm:$0xff]  ;;  %v285_v48 = vld [vmem:[%s2199_s6 + $0x118] sm:$0xff]  ;;  %p1929_p8 = pneg %p1928_p6 }
  0x79   : > { %853 = vmatpush1.bf16.msra.mxu1 %v1818_v30  ;;  %v266_v30 = vld [vmem:[%s2199_s6 + $0x80] sm:$0xff]  ;;  %v289_v49 = vld [vmem:[%s2199_s6 + $0x138] sm:$0xff]  ;;  %v395_v52 = vpack.c.bf16 %v287_v47, %v283_v46  ;;  %v299_v6 = vld [vmem:[%s2199_s6 + $0x188] sm:$0xff]  ;;  %p1935_p0 = por %p1934_p11, %p1933_p12 }
  0x7a   : > { %1046 = vmatpush1.bf16.msra.mxu0 %v1819_v31  ;;  %854 = vmatprep.subr.bf16.mxu1 %v1820_v32  ;;  %v270_v31 = vld [vmem:[%s2199_s6 + $0xa0] sm:$0xff]  ;;  %v268_v32 = vld [vmem:[%s2199_s6 + $0x90] sm:$0xff]  ;;  %v397_v53 = vpack.c.bf16 %v289_v49, %v285_v48  ;;  %v303_v7 = vld [vmem:[%s2199_s6 + $0x1a8] sm:$0xff] }
  0x7b   : > { %1047 = vmatprep.subr.bf16.mxu0 %v1822_v33  ;;  %v272_v33 = vld [vmem:[%s2199_s6 + $0xb0] sm:$0xff]  ;;  %v301_v8 = vld [vmem:[%s2199_s6 + $0x198] sm:$0xff]  ;;  %v403_v12 = vpack.c.bf16 %v303_v7, %v299_v6  ;;  %v307_v18 = vld [vmem:[%s2199_s6 + $0x1c8] sm:$0xff]  ;;  %p1936_p5 = pnand %p1935_p0, %p1929_p8 }
  0x7c   : > { %v305_v9 = vld [vmem:[%s2199_s6 + $0x1b8] sm:$0xff]  ;;  %v311_v19 = vld [vmem:[%s2199_s6 + $0x1e8] sm:$0xff] }
  0x7d   : > { %855 = vmatpush1.bf16.msra.mxu1 %v1824_v34  ;;  %v275_v34 = vld [vmem:[%s2199_s6 + $0xc8] sm:$0xff]  ;;  %v405_v13 = vpack.c.bf16 %v305_v9, %v301_v8  ;;  %v309_v20 = vld [vmem:[%s2199_s6 + $0x1d8] sm:$0xff]  ;;  %v407_v24 = vpack.c.bf16 %v311_v19, %v307_v18 }
  0x7e   : > { %1048 = vmatpush1.bf16.msra.mxu0 %v1825_v35  ;;  %856 = vmatprep.subr.bf16.mxu1 %v1826_v36  ;;  %v279_v35 = vld [vmem:[%s2199_s6 + $0xe8] sm:$0xff]  ;;  %v277_v36 = vld [vmem:[%s2199_s6 + $0xd8] sm:$0xff] }
  0x7f   : > { %1049 = vmatprep.subr.bf16.mxu0 %v1828_v37  ;;  %v281_v37 = vld [vmem:[%s2199_s6 + $0xf8] sm:$0xff] }
  0x80   : > { %v313_v21 = vld [vmem:[%s2199_s6 + $0x1f8] sm:$0xff] }
  0x81   : > { %857 = vmatpush1.bf16.msra.mxu1 %v1830_v38  ;;  %v386_v38 = vpack.c.bf16 %v270_v31, %v266_v30  ;;  %v409_v25 = vpack.c.bf16 %v313_v21, %v309_v20  ;;  %v315_v30 = vld [vmem:[%s2199_s6 + $0x208] sm:$0xff] }
  0x82   : > { %1050 = vmatpush1.bf16.msra.mxu0 %v1831_v39  ;;  %858 = vmatprep.subr.bf16.mxu1 %v1832_v40  ;;  %v388_v39 = vpack.c.bf16 %v272_v33, %v268_v32  ;;  %v391_v40 = vpack.c.bf16 %v279_v35, %v275_v34  ;;  %v319_v31 = vld [vmem:[%s2199_s6 + $0x228] sm:$0xff]  ;;  %v317_v32 = vld [vmem:[%s2199_s6 + $0x218] sm:$0xff] }
  0x83   : > { %1051 = vmatprep.subr.bf16.mxu0 %v1834_v41  ;;  %v393_v41 = vpack.c.bf16 %v281_v37, %v277_v36  ;;  %v321_v33 = vld [vmem:[%s2199_s6 + $0x238] sm:$0xff]  ;;  %v411_v36 = vpack.c.bf16 %v319_v31, %v315_v30 }
  0x84   : > { %v413_v37 = vpack.c.bf16 %v321_v33, %v317_v32 }
  0x85   : > { %859 = vmatpush1.bf16.msra.mxu1 %v1836_v42  ;;  %v274_v42 = vld [vmem:[%s2199_s6 + $0xc0] sm:$0xff] }
  0x86   : > { %1052 = vmatpush1.bf16.msra.mxu0 %v1837_v43  ;;  %860 = vmatprep.subr.bf16.mxu1 %v1838_v44  ;;  %v278_v43 = vld [vmem:[%s2199_s6 + $0xe0] sm:$0xff]  ;;  %v276_v44 = vld [vmem:[%s2199_s6 + $0xd0] sm:$0xff] }
  0x87   : > { %1053 = vmatprep.subr.bf16.mxu0 %v1840_v45  ;;  %v280_v45 = vld [vmem:[%s2199_s6 + $0xf0] sm:$0xff] }
  0x89   : > { %861 = vmatpush1.bf16.msra.mxu1 %v1842_v50  ;;  %v390_v50 = vpack.c.bf16 %v278_v43, %v274_v42  ;;  %v323_v42 = vld [vmem:[%s2199_s6 + $0x248] sm:$0xff] }
  0x8a   : > { %1054 = vmatpush1.bf16.msra.mxu0 %v1843_v51  ;;  %862 = vmatprep.subr.bf16.mxu1 %v1844_v54  ;;  %v392_v51 = vpack.c.bf16 %v280_v45, %v276_v44  ;;  %v282_v54 = vld [vmem:[%s2199_s6 + $0x100] sm:$0xff]  ;;  %v327_v43 = vld [vmem:[%s2199_s6 + $0x268] sm:$0xff]  ;;  %v325_v44 = vld [vmem:[%s2199_s6 + $0x258] sm:$0xff] }
  0x8b   : > { %1055 = vmatprep.subr.bf16.mxu0 %v1846_v55  ;;  %v286_v55 = vld [vmem:[%s2199_s6 + $0x120] sm:$0xff]  ;;  %v329_v45 = vld [vmem:[%s2199_s6 + $0x278] sm:$0xff]  ;;  %v415_v48 = vpack.c.bf16 %v327_v43, %v323_v42 }
  0x8c   : > { %v417_v49 = vpack.c.bf16 %v329_v45, %v325_v44 }
  0x8d   : > { %863 = vmatpush1.bf16.msra.mxu1 %v1848_v56  ;;  %v284_v56 = vld [vmem:[%s2199_s6 + $0x110] sm:$0xff] }
  0x8e   : > { %1056 = vmatpush1.bf16.msra.mxu0 %v1849_v57  ;;  %864 = vmatprep.subr.bf16.mxu1 %v1850_v58  ;;  %v288_v57 = vld [vmem:[%s2199_s6 + $0x130] sm:$0xff]  ;;  %v291_v58 = vld [vmem:[%s2199_s6 + $0x148] sm:$0xff] }
  0x8f   : > { %1057 = vmatprep.subr.bf16.mxu0 %v1852_v59  ;;  %v295_v59 = vld [vmem:[%s2199_s6 + $0x168] sm:$0xff] }
  0x91   : > { %865 = vmatpush1.bf16.msra.mxu1 %v1854_v60  ;;  %v293_v60 = vld [vmem:[%s2199_s6 + $0x158] sm:$0xff] }
  0x92   : > { %1058 = vmatpush1.bf16.msra.mxu0 %v1855_v61  ;;  %866 = vmatprep.subr.bf16.mxu1 %v1856_v62  ;;  %v297_v61 = vld [vmem:[%s2199_s6 + $0x178] sm:$0xff]  ;;  %v394_v62 = vpack.c.bf16 %v286_v55, %v282_v54  ;;  %v331_v54 = vld [vmem:[%s2199_s6 + $0x288] sm:$0xff] }
  0x93   : > { %1059 = vmatprep.subr.bf16.mxu0 %v1858_v63  ;;  %v396_v63 = vpack.c.bf16 %v288_v57, %v284_v56  ;;  %v335_v55 = vld [vmem:[%s2199_s6 + $0x2a8] sm:$0xff]  ;;  %v333_v56 = vld [vmem:[%s2199_s6 + $0x298] sm:$0xff] }
  0x94   : > { %v337_v57 = vld [vmem:[%s2199_s6 + $0x2b8] sm:$0xff] }
  0x95   : > { %867 = vmatpush1.bf16.msra.mxu1 %v1860_v0  ;;  %v399_v0 = vpack.c.bf16 %v295_v59, %v291_v58 }
  0x96   : > { %1060 = vmatpush1.bf16.msra.mxu0 %v1861_v1  ;;  %868 = vmatprep.subr.bf16.mxu1 %v1862_v2  ;;  %v401_v1 = vpack.c.bf16 %v297_v61, %v293_v60  ;;  %v290_v2 = vld [vmem:[%s2199_s6 + $0x140] sm:$0xff]  ;;  %v419_v60 = vpack.c.bf16 %v335_v55, %v331_v54  ;;  %v421_v61 = vpack.c.bf16 %v337_v57, %v333_v56 }
  0x97   : > { %1061 = vmatprep.subr.bf16.mxu0 %v1864_v3  ;;  %v294_v3 = vld [vmem:[%s2199_s6 + $0x160] sm:$0xff] }
  0x98   : > { %v398_v10 = vpack.c.bf16 %v294_v3, %v290_v2  ;;  %v339_v2 = vld [vmem:[%s2199_s6 + $0x2c8] sm:$0xff] }
  0x99   : > { %869 = vmatpush1.bf16.msra.mxu1 %v1866_v4  ;;  %v292_v4 = vld [vmem:[%s2199_s6 + $0x150] sm:$0xff]  ;;  %v343_v3 = vld [vmem:[%s2199_s6 + $0x2e8] sm:$0xff] }
  0x9a   : > { %1062 = vmatpush1.bf16.msra.mxu0 %v1867_v5  ;;  %v296_v5 = vld [vmem:[%s2199_s6 + $0x170] sm:$0xff]  ;;  %v423_v8 = vpack.c.bf16 %v343_v3, %v339_v2  ;;  %v506_v3 = vld [vmem:[%s2533_s2] sm:$0x3] }
  0x9b   : > { %v400_v11 = vpack.c.bf16 %v296_v5, %v292_v4  ;;  %v341_v4 = vld [vmem:[%s2199_s6 + $0x2d8] sm:$0xff] }
  0x9c   : > { %871 = vmatmul.mubr.bf16.vlgmr.msra.gmra.mrb[0].mxu1 %v378_v14  ;;  %v298_v14 = vld [vmem:[%s2199_s6 + $0x180] sm:$0xff]  ;;  %v345_v5 = vld [vmem:[%s2199_s6 + $0x2f8] sm:$0xff] }
  0x9d   : > { %1064 = vmatmul.mubr.bf16.vlgmr.msra.gmra.mrb[0].mxu0 %v380_v15  ;;  %880 = vmatprep.mubr.bf16.mxu1 %v383_v16  ;;  %v302_v15 = vld [vmem:[%s2199_s6 + $0x1a0] sm:$0xff]  ;;  %v300_v16 = vld [vmem:[%s2199_s6 + $0x190] sm:$0xff]  ;;  %v425_v9 = vpack.c.bf16 %v345_v5, %v341_v4 }
  0x9e   : > { %1073 = vmatprep.mubr.bf16.mxu0 %v385_v17  ;;  %v304_v17 = vld [vmem:[%s2199_s6 + $0x1b0] sm:$0xff]  ;;  %v402_v22 = vpack.c.bf16 %v302_v15, %v298_v14  ;;  %v347_v14 = vld [vmem:[%s2199_s6 + $0x308] sm:$0xff] }
  0x9f   : > { %v404_v23 = vpack.c.bf16 %v304_v17, %v300_v16  ;;  %v351_v15 = vld [vmem:[%s2199_s6 + $0x328] sm:$0xff]  ;;  %v349_v16 = vld [vmem:[%s2199_s6 + $0x318] sm:$0xff] }
  0xa0   : > { %v353_v17 = vld [vmem:[%s2199_s6 + $0x338] sm:$0xff]  ;;  %v427_v20 = vpack.c.bf16 %v351_v15, %v347_v14 }
  0xa1   : > { %v429_v21 = vpack.c.bf16 %v353_v17, %v349_v16 }
  0xa4   : > { %881 = vmatmul.mubr.bf16.gmra.mrb[4].mxu1 %v382_v26  ;;  %v306_v26 = vld [vmem:[%s2199_s6 + $0x1c0] sm:$0xff] }
  0xa5   : > { %1074 = vmatmul.mubr.bf16.gmra.mrb[4].mxu0 %v384_v27  ;;  %890 = vmatprep.mubr.bf16.mxu1 %v387_v28  ;;  %v310_v27 = vld [vmem:[%s2199_s6 + $0x1e0] sm:$0xff]  ;;  %v308_v28 = vld [vmem:[%s2199_s6 + $0x1d0] sm:$0xff] }
  0xa6   : > { %1083 = vmatprep.mubr.bf16.mxu0 %v389_v29  ;;  %v312_v29 = vld [vmem:[%s2199_s6 + $0x1f0] sm:$0xff]  ;;  %v406_v34 = vpack.c.bf16 %v310_v27, %v306_v26  ;;  %v355_v26 = vld [vmem:[%s2199_s6 + $0x348] sm:$0xff] }
  0xa7   : > { %v408_v35 = vpack.c.bf16 %v312_v29, %v308_v28  ;;  %v359_v27 = vld [vmem:[%s2199_s6 + $0x368] sm:$0xff]  ;;  %v357_v28 = vld [vmem:[%s2199_s6 + $0x358] sm:$0xff] }
  0xa8   : > { %v361_v29 = vld [vmem:[%s2199_s6 + $0x378] sm:$0xff]  ;;  %v431_v32 = vpack.c.bf16 %v359_v27, %v355_v26 }
  0xa9   : > { %v433_v33 = vpack.c.bf16 %v361_v29, %v357_v28 }
  0xac   : > { %891 = vmatmul.mubr.bf16.gmra.mrb[8].mxu1 %v386_v38  ;;  %v314_v38 = vld [vmem:[%s2199_s6 + $0x200] sm:$0xff] }
  0xad   : > { %1084 = vmatmul.mubr.bf16.gmra.mrb[8].mxu0 %v388_v39  ;;  %900 = vmatprep.mubr.bf16.mxu1 %v391_v40  ;;  %v318_v39 = vld [vmem:[%s2199_s6 + $0x220] sm:$0xff]  ;;  %v316_v40 = vld [vmem:[%s2199_s6 + $0x210] sm:$0xff] }
  0xae   : > { %1093 = vmatprep.mubr.bf16.mxu0 %v393_v41  ;;  %v320_v41 = vld [vmem:[%s2199_s6 + $0x230] sm:$0xff]  ;;  %v410_v46 = vpack.c.bf16 %v318_v39, %v314_v38  ;;  %v363_v38 = vld [vmem:[%s2199_s6 + $0x388] sm:$0xff] }
  0xaf   : > { %v412_v47 = vpack.c.bf16 %v320_v41, %v316_v40  ;;  %v367_v39 = vld [vmem:[%s2199_s6 + $0x3a8] sm:$0xff]  ;;  %v365_v40 = vld [vmem:[%s2199_s6 + $0x398] sm:$0xff] }
  0xb0   : > { %v369_v41 = vld [vmem:[%s2199_s6 + $0x3b8] sm:$0xff]  ;;  %v435_v44 = vpack.c.bf16 %v367_v39, %v363_v38 }
  0xb1   : > { %v437_v45 = vpack.c.bf16 %v369_v41, %v365_v40 }
  0xb4   : > { %901 = vmatmul.mubr.bf16.gmra.mrb[12].mxu1 %v390_v50  ;;  %v322_v50 = vld [vmem:[%s2199_s6 + $0x240] sm:$0xff] }
  0xb5   : > { %1094 = vmatmul.mubr.bf16.gmra.mrb[12].mxu0 %v392_v51  ;;  %910 = vmatprep.mubr.bf16.mxu1 %v395_v52  ;;  %v326_v51 = vld [vmem:[%s2199_s6 + $0x260] sm:$0xff]  ;;  %v324_v52 = vld [vmem:[%s2199_s6 + $0x250] sm:$0xff] }
  0xb6   : > { %1103 = vmatprep.mubr.bf16.mxu0 %v397_v53  ;;  %v328_v53 = vld [vmem:[%s2199_s6 + $0x270] sm:$0xff]  ;;  %v414_v58 = vpack.c.bf16 %v326_v51, %v322_v50  ;;  %v371_v50 = vld [vmem:[%s2199_s6 + $0x3c8] sm:$0xff] }
  0xb7   : > { %v416_v59 = vpack.c.bf16 %v328_v53, %v324_v52  ;;  %v375_v51 = vld [vmem:[%s2199_s6 + $0x3e8] sm:$0xff]  ;;  %v373_v52 = vld [vmem:[%s2199_s6 + $0x3d8] sm:$0xff] }
  0xb8   : > { %v377_v53 = vld [vmem:[%s2199_s6 + $0x3f8] sm:$0xff]  ;;  %v439_v56 = vpack.c.bf16 %v375_v51, %v371_v50 }
  0xb9   : > { %v441_v57 = vpack.c.bf16 %v377_v53, %v373_v52 }
  0xbc   : > { %911 = vmatmul.mubr.bf16.gmra.mrb[16].mxu1 %v394_v62  ;;  %v330_v62 = vld [vmem:[%s2199_s6 + $0x280] sm:$0xff] }
  0xbd   : > { %1104 = vmatmul.mubr.bf16.gmra.mrb[16].mxu0 %v396_v63  ;;  %920 = vmatprep.mubr.bf16.mxu1 %v399_v0  ;;  %v334_v63 = vld [vmem:[%s2199_s6 + $0x2a0] sm:$0xff]  ;;  %v332_v0 = vld [vmem:[%s2199_s6 + $0x290] sm:$0xff] }
  0xbe   : > { %1113 = vmatprep.mubr.bf16.mxu0 %v401_v1  ;;  %v336_v1 = vld [vmem:[%s2199_s6 + $0x2b0] sm:$0xff]  ;;  %v418_v6 = vpack.c.bf16 %v334_v63, %v330_v62 }
  0xbf   : > { %v420_v7 = vpack.c.bf16 %v336_v1, %v332_v0  ;;  %v508_v0 = vlaneseq }
  0xc1   : > { %v509_v1 = vshrl.u32 %v508_v0, 7 }
  0xc3   : > { %v510_v2 = vsub.s32 0, %v509_v1  ;;  %v514_v4 = vsub.s32 1, %v509_v1 }
  0xc4   : > { %921 = vmatmul.mubr.bf16.gmra.mrb[20].mxu1 %v398_v10  ;;  %v338_v10 = vld [vmem:[%s2199_s6 + $0x2c0] sm:$0xff] }
  0xc5   : > { %1114 = vmatmul.mubr.bf16.gmra.mrb[20].mxu0 %v400_v11  ;;  %930 = vmatprep.mubr.bf16.mxu1 %v403_v12  ;;  %v342_v11 = vld [vmem:[%s2199_s6 + $0x2e0] sm:$0xff]  ;;  %v340_v12 = vld [vmem:[%s2199_s6 + $0x2d0] sm:$0xff]  ;;  %v2340_v5 = vrot.slane %v506_v3, %v510_v2 }
  0xc6   : > { %1123 = vmatprep.mubr.bf16.mxu0 %v405_v13  ;;  %v344_v13 = vld [vmem:[%s2199_s6 + $0x2f0] sm:$0xff]  ;;  %v422_v18 = vpack.c.bf16 %v342_v11, %v338_v10 }
  0xc7   : > { %v424_v19 = vpack.c.bf16 %v344_v13, %v340_v12 }
  0xcc   : > { %931 = vmatmul.mubr.bf16.gmra.mrb[24].mxu1 %v402_v22  ;;  %v346_v22 = vld [vmem:[%s2199_s6 + $0x300] sm:$0xff] }
  0xcd   : > { %1124 = vmatmul.mubr.bf16.gmra.mrb[24].mxu0 %v404_v23  ;;  %940 = vmatprep.mubr.bf16.mxu1 %v407_v24  ;;  %v350_v23 = vld [vmem:[%s2199_s6 + $0x320] sm:$0xff]  ;;  %v348_v24 = vld [vmem:[%s2199_s6 + $0x310] sm:$0xff] }
  0xce   : > { %1133 = vmatprep.mubr.bf16.mxu0 %v409_v25  ;;  %v352_v25 = vld [vmem:[%s2199_s6 + $0x330] sm:$0xff]  ;;  %v426_v30 = vpack.c.bf16 %v350_v23, %v346_v22 }
  0xcf   : > { %v428_v31 = vpack.c.bf16 %v352_v25, %v348_v24 }
  0xd4   : > { %941 = vmatmul.mubr.bf16.gmra.mrb[28].mxu1 %v406_v34  ;;  %v354_v34 = vld [vmem:[%s2199_s6 + $0x340] sm:$0xff] }
  0xd5   : > { %1134 = vmatmul.mubr.bf16.gmra.mrb[28].mxu0 %v408_v35  ;;  %950 = vmatprep.mubr.bf16.mxu1 %v411_v36  ;;  %v358_v35 = vld [vmem:[%s2199_s6 + $0x360] sm:$0xff]  ;;  %v356_v36 = vld [vmem:[%s2199_s6 + $0x350] sm:$0xff] }
  0xd6   : > { %1143 = vmatprep.mubr.bf16.mxu0 %v413_v37  ;;  %v360_v37 = vld [vmem:[%s2199_s6 + $0x370] sm:$0xff]  ;;  %v430_v42 = vpack.c.bf16 %v358_v35, %v354_v34 }
  0xd7   : > { %v432_v43 = vpack.c.bf16 %v360_v37, %v356_v36 }
  0xdc   : > { %951 = vmatmul.mubr.bf16.gmra.mrb[32].mxu1 %v410_v46  ;;  %v362_v46 = vld [vmem:[%s2199_s6 + $0x380] sm:$0xff] }
  0xdd   : > { %1144 = vmatmul.mubr.bf16.gmra.mrb[32].mxu0 %v412_v47  ;;  %960 = vmatprep.mubr.bf16.mxu1 %v415_v48  ;;  %v366_v47 = vld [vmem:[%s2199_s6 + $0x3a0] sm:$0xff]  ;;  %v364_v48 = vld [vmem:[%s2199_s6 + $0x390] sm:$0xff] }
  0xde   : > { %1153 = vmatprep.mubr.bf16.mxu0 %v417_v49  ;;  %v368_v49 = vld [vmem:[%s2199_s6 + $0x3b0] sm:$0xff]  ;;  %v434_v54 = vpack.c.bf16 %v366_v47, %v362_v46 }
  0xdf   : > { %v436_v55 = vpack.c.bf16 %v368_v49, %v364_v48 }
  0xe4   : > { %961 = vmatmul.mubr.bf16.gmra.mrb[36].mxu1 %v414_v58  ;;  %v370_v58 = vld [vmem:[%s2199_s6 + $0x3c0] sm:$0xff] }
  0xe5   : > { %1154 = vmatmul.mubr.bf16.gmra.mrb[36].mxu0 %v416_v59  ;;  %970 = vmatprep.mubr.bf16.mxu1 %v419_v60  ;;  %v374_v59 = vld [vmem:[%s2199_s6 + $0x3e0] sm:$0xff]  ;;  %v372_v60 = vld [vmem:[%s2199_s6 + $0x3d0] sm:$0xff] }
  0xe6   : > { %1163 = vmatprep.mubr.bf16.mxu0 %v421_v61  ;;  %v376_v61 = vld [vmem:[%s2199_s6 + $0x3f0] sm:$0xff]  ;;  %v438_v62 = vpack.c.bf16 %v374_v59, %v370_v58 }
  0xe7   : > { %v440_v63 = vpack.c.bf16 %v376_v61, %v372_v60 }
  0xec   : > { %971 = vmatmul.mubr.bf16.gmra.mrb[40].mxu1 %v418_v6  ;;  %v2342_v6 = vrot.slane %v506_v3, %v514_v4 }
  0xed   : > { %1164 = vmatmul.mubr.bf16.gmra.mrb[40].mxu0 %v420_v7  ;;  %980 = vmatprep.mubr.bf16.mxu1 %v423_v8 }
  0xee   : > { %1173 = vmatprep.mubr.bf16.mxu0 %v425_v9 }
  0xf4   : > { %981 = vmatmul.mubr.bf16.gmra.mrb[44].mxu1 %v422_v18 }
  0xf5   : > { %1174 = vmatmul.mubr.bf16.gmra.mrb[44].mxu0 %v424_v19  ;;  %990 = vmatprep.mubr.bf16.mxu1 %v427_v20 }
  0xf6   : > { %1183 = vmatprep.mubr.bf16.mxu0 %v429_v21 }
  0xfc   : > { %991 = vmatmul.mubr.bf16.gmra.mrb[48].mxu1 %v426_v30 }
  0xfd   : > { %1184 = vmatmul.mubr.bf16.gmra.mrb[48].mxu0 %v428_v31  ;;  %1000 = vmatprep.mubr.bf16.mxu1 %v431_v32 }
  0xfe   : > { %1193 = vmatprep.mubr.bf16.mxu0 %v433_v33 }
 0x104   : > { %1001 = vmatmul.mubr.bf16.gmra.mrb[52].mxu1 %v430_v42 }
 0x105   : > { %1194 = vmatmul.mubr.bf16.gmra.mrb[52].mxu0 %v432_v43  ;;  %1010 = vmatprep.mubr.bf16.mxu1 %v435_v44 }
 0x106   : > { %1203 = vmatprep.mubr.bf16.mxu0 %v437_v45 }
 0x10c   : > { %1011 = vmatmul.mubr.bf16.gmra.mrb[56].mxu1 %v434_v54 }
 0x10d   : > { %1204 = vmatmul.mubr.bf16.gmra.mrb[56].mxu0 %v436_v55  ;;  %1020 = vmatprep.mubr.bf16.mxu1 %v439_v56 }
 0x10e   : > { %1213 = vmatprep.mubr.bf16.mxu0 %v441_v57 }
 0x114   : > { %1021 = vmatmul.mubr.bf16.gmra.mrb[60].mxu1 %v438_v62 }
 0x115   : > { %1214 = vmatmul.mubr.bf16.gmra.mrb[60].mxu0 %v440_v63 }
 0x16f   : > { %v872_v7 = vpop.f32.mrb[0].mxu1 }
 0x170   : > { %v1065_v8 = vpop.f32.mrb[0].mxu0  ;;  %v873_v9 = vadd.f32 %v872_v7, %v2340_v5  ;;  %v874_v10 = vpop.f32.mrb[1].mxu1 }
 0x171   : > { %v1067_v11 = vpop.f32.mrb[1].mxu0  ;;  %v875_v12 = vadd.f32 %v874_v10, %v2342_v6  ;;  %v876_v13 = vpop.f32.mrb[2].mxu1 }
 0x172   : > { %v1069_v14 = vpop.f32.mrb[2].mxu0  ;;  %v1066_v15 = vadd.f32 %v1065_v8, %v873_v9  ;;  %v877_v16 = vadd.f32 %v876_v13, %v2340_v5  ;;  %v878_v17 = vpop.f32.mrb[3].mxu1 }
 0x173   : > { %v1071_v18 = vpop.f32.mrb[3].mxu0  ;;  %v1068_v19 = vadd.f32 %v1067_v11, %v875_v12  ;;  %v879_v20 = vadd.f32 %v878_v17, %v2342_v6 }
 0x174   : > { %v1224_v21 = vmax.f32 %v1066_v15, 0.0  ;;  %v1070_v22 = vadd.f32 %v1069_v14, %v877_v16 }
 0x175   : > { %v1225_v23 = vmax.f32 %v1068_v19, 0.0  ;;  %v1072_v24 = vadd.f32 %v1071_v18, %v879_v20 }
 0x176   : > { %1288 = vst [vmem:[%s2349_s9] sm:$0xff] %v1224_v21  ;;  %v1226_v25 = vmax.f32 %v1070_v22, 0.0 }
 0x177   : > { %1289 = vst [vmem:[%s2349_s9 + $0x8] sm:$0xff] %v1225_v23  ;;  %v1227_v26 = vmax.f32 %v1072_v24, 0.0  ;;  %v882_v27 = vpop.f32.mrb[4].mxu1 }
 0x178   : > { %v1075_v28 = vpop.f32.mrb[4].mxu0  ;;  %1290 = vst [vmem:[%s2349_s9 + $0x10] sm:$0xff] %v1226_v25  ;;  %v883_v29 = vadd.f32 %v882_v27, %v2340_v5  ;;  %v884_v30 = vpop.f32.mrb[5].mxu1 }
 0x179   : > { %v1077_v31 = vpop.f32.mrb[5].mxu0  ;;  %1291 = vst [vmem:[%s2349_s9 + $0x18] sm:$0xff] %v1227_v26  ;;  %v885_v32 = vadd.f32 %v884_v30, %v2342_v6  ;;  %v886_v33 = vpop.f32.mrb[6].mxu1 }
 0x17a   : > { %v1079_v34 = vpop.f32.mrb[6].mxu0  ;;  %v1076_v35 = vadd.f32 %v1075_v28, %v883_v29  ;;  %v887_v36 = vadd.f32 %v886_v33, %v2340_v5  ;;  %v888_v37 = vpop.f32.mrb[7].mxu1 }
 0x17b   : > { %v1081_v38 = vpop.f32.mrb[7].mxu0  ;;  %v1078_v39 = vadd.f32 %v1077_v31, %v885_v32  ;;  %v889_v40 = vadd.f32 %v888_v37, %v2342_v6 }
 0x17c   : > { %v1228_v41 = vmax.f32 %v1076_v35, 0.0  ;;  %v1080_v42 = vadd.f32 %v1079_v34, %v887_v36 }
 0x17d   : > { %v1229_v43 = vmax.f32 %v1078_v39, 0.0  ;;  %v1082_v44 = vadd.f32 %v1081_v38, %v889_v40 }
 0x17e   : > { %1292 = vst [vmem:[%s2349_s9 + $0x20] sm:$0xff] %v1228_v41  ;;  %v1230_v45 = vmax.f32 %v1080_v42, 0.0 }
 0x17f   : > { %1293 = vst [vmem:[%s2349_s9 + $0x28] sm:$0xff] %v1229_v43  ;;  %v1231_v46 = vmax.f32 %v1082_v44, 0.0  ;;  %v892_v47 = vpop.f32.mrb[8].mxu1 }
 0x180   : > { %v1085_v48 = vpop.f32.mrb[8].mxu0  ;;  %1294 = vst [vmem:[%s2349_s9 + $0x30] sm:$0xff] %v1230_v45  ;;  %v893_v49 = vadd.f32 %v892_v47, %v2340_v5  ;;  %v894_v50 = vpop.f32.mrb[9].mxu1 }
 0x181   : > { %v1087_v51 = vpop.f32.mrb[9].mxu0  ;;  %1295 = vst [vmem:[%s2349_s9 + $0x38] sm:$0xff] %v1231_v46  ;;  %v895_v52 = vadd.f32 %v894_v50, %v2342_v6  ;;  %v896_v53 = vpop.f32.mrb[10].mxu1 }
 0x182   : > { %v1089_v54 = vpop.f32.mrb[10].mxu0  ;;  %v1086_v55 = vadd.f32 %v1085_v48, %v893_v49  ;;  %v897_v56 = vadd.f32 %v896_v53, %v2340_v5  ;;  %v898_v57 = vpop.f32.mrb[11].mxu1 }
 0x183   : > { %v1091_v58 = vpop.f32.mrb[11].mxu0  ;;  %v1088_v59 = vadd.f32 %v1087_v51, %v895_v52  ;;  %v899_v60 = vadd.f32 %v898_v57, %v2342_v6 }
 0x184   : > { %v1232_v61 = vmax.f32 %v1086_v55, 0.0  ;;  %v1090_v62 = vadd.f32 %v1089_v54, %v897_v56 }
 0x185   : > { %v1233_v63 = vmax.f32 %v1088_v59, 0.0  ;;  %v1092_v0 = vadd.f32 %v1091_v58, %v899_v60 }
 0x186   : > { %1296 = vst [vmem:[%s2349_s9 + $0x40] sm:$0xff] %v1232_v61  ;;  %v1234_v1 = vmax.f32 %v1090_v62, 0.0 }
 0x187   : > { %1297 = vst [vmem:[%s2349_s9 + $0x48] sm:$0xff] %v1233_v63  ;;  %v1235_v2 = vmax.f32 %v1092_v0, 0.0  ;;  %v902_v3 = vpop.f32.mrb[12].mxu1 }
 0x188   : > { %v1095_v4 = vpop.f32.mrb[12].mxu0  ;;  %1298 = vst [vmem:[%s2349_s9 + $0x50] sm:$0xff] %v1234_v1  ;;  %v903_v7 = vadd.f32 %v902_v3, %v2340_v5  ;;  %v904_v8 = vpop.f32.mrb[13].mxu1 }
 0x189   : > { %v1097_v9 = vpop.f32.mrb[13].mxu0  ;;  %1299 = vst [vmem:[%s2349_s9 + $0x58] sm:$0xff] %v1235_v2  ;;  %v905_v10 = vadd.f32 %v904_v8, %v2342_v6  ;;  %v906_v11 = vpop.f32.mrb[14].mxu1 }
 0x18a   : > { %v1099_v12 = vpop.f32.mrb[14].mxu0  ;;  %v1096_v13 = vadd.f32 %v1095_v4, %v903_v7  ;;  %v907_v14 = vadd.f32 %v906_v11, %v2340_v5  ;;  %v908_v15 = vpop.f32.mrb[15].mxu1 }
 0x18b   : > { %v1101_v16 = vpop.f32.mrb[15].mxu0  ;;  %v1098_v17 = vadd.f32 %v1097_v9, %v905_v10  ;;  %v909_v18 = vadd.f32 %v908_v15, %v2342_v6 }
 0x18c   : > { %v1236_v19 = vmax.f32 %v1096_v13, 0.0  ;;  %v1100_v20 = vadd.f32 %v1099_v12, %v907_v14 }
 0x18d   : > { %v1237_v21 = vmax.f32 %v1098_v17, 0.0  ;;  %v1102_v22 = vadd.f32 %v1101_v16, %v909_v18 }
 0x18e   : > { %1300 = vst [vmem:[%s2349_s9 + $0x60] sm:$0xff] %v1236_v19  ;;  %v1238_v23 = vmax.f32 %v1100_v20, 0.0 }
 0x18f   : > { %1301 = vst [vmem:[%s2349_s9 + $0x68] sm:$0xff] %v1237_v21  ;;  %v1239_v24 = vmax.f32 %v1102_v22, 0.0  ;;  %v912_v25 = vpop.f32.mrb[16].mxu1 }
 0x190   : > { %v1105_v26 = vpop.f32.mrb[16].mxu0  ;;  %1302 = vst [vmem:[%s2349_s9 + $0x70] sm:$0xff] %v1238_v23  ;;  %v913_v27 = vadd.f32 %v912_v25, %v2340_v5  ;;  %v914_v28 = vpop.f32.mrb[17].mxu1 }
 0x191   : > { %v1107_v29 = vpop.f32.mrb[17].mxu0  ;;  %1303 = vst [vmem:[%s2349_s9 + $0x78] sm:$0xff] %v1239_v24  ;;  %v915_v30 = vadd.f32 %v914_v28, %v2342_v6  ;;  %v916_v31 = vpop.f32.mrb[18].mxu1 }
 0x192   : > { %v1109_v32 = vpop.f32.mrb[18].mxu0  ;;  %v1106_v33 = vadd.f32 %v1105_v26, %v913_v27  ;;  %v917_v34 = vadd.f32 %v916_v31, %v2340_v5  ;;  %v918_v35 = vpop.f32.mrb[19].mxu1 }
 0x193   : > { %v1111_v36 = vpop.f32.mrb[19].mxu0  ;;  %v1108_v37 = vadd.f32 %v1107_v29, %v915_v30  ;;  %v919_v38 = vadd.f32 %v918_v35, %v2342_v6 }
 0x194   : > { %v1240_v39 = vmax.f32 %v1106_v33, 0.0  ;;  %v1110_v40 = vadd.f32 %v1109_v32, %v917_v34 }
 0x195   : > { %v1241_v41 = vmax.f32 %v1108_v37, 0.0  ;;  %v1112_v42 = vadd.f32 %v1111_v36, %v919_v38 }
 0x196   : > { %1304 = vst [vmem:[%s2349_s9 + $0x80] sm:$0xff] %v1240_v39  ;;  %v1242_v43 = vmax.f32 %v1110_v40, 0.0 }
 0x197   : > { %1305 = vst [vmem:[%s2349_s9 + $0x88] sm:$0xff] %v1241_v41  ;;  %v1243_v44 = vmax.f32 %v1112_v42, 0.0  ;;  %v922_v45 = vpop.f32.mrb[20].mxu1 }
 0x198   : > { %v1115_v46 = vpop.f32.mrb[20].mxu0  ;;  %1306 = vst [vmem:[%s2349_s9 + $0x90] sm:$0xff] %v1242_v43  ;;  %v923_v47 = vadd.f32 %v922_v45, %v2340_v5  ;;  %v924_v48 = vpop.f32.mrb[21].mxu1 }
 0x199   : > { %v1117_v49 = vpop.f32.mrb[21].mxu0  ;;  %1307 = vst [vmem:[%s2349_s9 + $0x98] sm:$0xff] %v1243_v44  ;;  %v925_v50 = vadd.f32 %v924_v48, %v2342_v6  ;;  %v926_v51 = vpop.f32.mrb[22].mxu1 }
 0x19a   : > { %v1119_v52 = vpop.f32.mrb[22].mxu0  ;;  %v1116_v53 = vadd.f32 %v1115_v46, %v923_v47  ;;  %v927_v54 = vadd.f32 %v926_v51, %v2340_v5  ;;  %v928_v55 = vpop.f32.mrb[23].mxu1 }
 0x19b   : > { %v1121_v56 = vpop.f32.mrb[23].mxu0  ;;  %v1118_v57 = vadd.f32 %v1117_v49, %v925_v50  ;;  %v929_v58 = vadd.f32 %v928_v55, %v2342_v6 }
 0x19c   : > { %v1244_v59 = vmax.f32 %v1116_v53, 0.0  ;;  %v1120_v60 = vadd.f32 %v1119_v52, %v927_v54 }
 0x19d   : > { %v1245_v61 = vmax.f32 %v1118_v57, 0.0  ;;  %v1122_v62 = vadd.f32 %v1121_v56, %v929_v58 }
 0x19e   : > { %1308 = vst [vmem:[%s2349_s9 + $0xa0] sm:$0xff] %v1244_v59  ;;  %v1246_v63 = vmax.f32 %v1120_v60, 0.0 }
 0x19f   : > { %1309 = vst [vmem:[%s2349_s9 + $0xa8] sm:$0xff] %v1245_v61  ;;  %v1247_v0 = vmax.f32 %v1122_v62, 0.0  ;;  %v932_v1 = vpop.f32.mrb[24].mxu1 }
 0x1a0   : > { %v1125_v2 = vpop.f32.mrb[24].mxu0  ;;  %1310 = vst [vmem:[%s2349_s9 + $0xb0] sm:$0xff] %v1246_v63  ;;  %v933_v3 = vadd.f32 %v932_v1, %v2340_v5  ;;  %v934_v4 = vpop.f32.mrb[25].mxu1 }
 0x1a1   : > { %v1127_v7 = vpop.f32.mrb[25].mxu0  ;;  %1311 = vst [vmem:[%s2349_s9 + $0xb8] sm:$0xff] %v1247_v0  ;;  %v935_v8 = vadd.f32 %v934_v4, %v2342_v6  ;;  %v936_v9 = vpop.f32.mrb[26].mxu1 }
 0x1a2   : > { %v1129_v10 = vpop.f32.mrb[26].mxu0  ;;  %v1126_v11 = vadd.f32 %v1125_v2, %v933_v3  ;;  %v937_v12 = vadd.f32 %v936_v9, %v2340_v5  ;;  %v938_v13 = vpop.f32.mrb[27].mxu1 }
 0x1a3   : > { %v1131_v14 = vpop.f32.mrb[27].mxu0  ;;  %v1128_v15 = vadd.f32 %v1127_v7, %v935_v8  ;;  %v939_v16 = vadd.f32 %v938_v13, %v2342_v6 }
 0x1a4   : > { %v1248_v17 = vmax.f32 %v1126_v11, 0.0  ;;  %v1130_v18 = vadd.f32 %v1129_v10, %v937_v12 }
 0x1a5   : > { %v1249_v19 = vmax.f32 %v1128_v15, 0.0  ;;  %v1132_v20 = vadd.f32 %v1131_v14, %v939_v16 }
 0x1a6   : > { %1312 = vst [vmem:[%s2349_s9 + $0xc0] sm:$0xff] %v1248_v17  ;;  %v1250_v21 = vmax.f32 %v1130_v18, 0.0 }
 0x1a7   : > { %1313 = vst [vmem:[%s2349_s9 + $0xc8] sm:$0xff] %v1249_v19  ;;  %v1251_v22 = vmax.f32 %v1132_v20, 0.0  ;;  %v942_v23 = vpop.f32.mrb[28].mxu1 }
 0x1a8   : > { %v1135_v24 = vpop.f32.mrb[28].mxu0  ;;  %1314 = vst [vmem:[%s2349_s9 + $0xd0] sm:$0xff] %v1250_v21  ;;  %v943_v25 = vadd.f32 %v942_v23, %v2340_v5  ;;  %v944_v26 = vpop.f32.mrb[29].mxu1 }
 0x1a9   : > { %v1137_v27 = vpop.f32.mrb[29].mxu0  ;;  %1315 = vst [vmem:[%s2349_s9 + $0xd8] sm:$0xff] %v1251_v22  ;;  %v945_v28 = vadd.f32 %v944_v26, %v2342_v6  ;;  %v946_v29 = vpop.f32.mrb[30].mxu1 }
 0x1aa   : > { %v1139_v30 = vpop.f32.mrb[30].mxu0  ;;  %v1136_v31 = vadd.f32 %v1135_v24, %v943_v25  ;;  %v947_v32 = vadd.f32 %v946_v29, %v2340_v5  ;;  %v948_v33 = vpop.f32.mrb[31].mxu1 }
 0x1ab   : > { %v1141_v34 = vpop.f32.mrb[31].mxu0  ;;  %v1138_v35 = vadd.f32 %v1137_v27, %v945_v28  ;;  %v949_v36 = vadd.f32 %v948_v33, %v2342_v6 }
 0x1ac   : > { %v1252_v37 = vmax.f32 %v1136_v31, 0.0  ;;  %v1140_v38 = vadd.f32 %v1139_v30, %v947_v32 }
 0x1ad   : > { %v1253_v39 = vmax.f32 %v1138_v35, 0.0  ;;  %v1142_v40 = vadd.f32 %v1141_v34, %v949_v36 }
 0x1ae   : > { %1316 = vst [vmem:[%s2349_s9 + $0xe0] sm:$0xff] %v1252_v37  ;;  %v1254_v41 = vmax.f32 %v1140_v38, 0.0 }
 0x1af   : > { %1317 = vst [vmem:[%s2349_s9 + $0xe8] sm:$0xff] %v1253_v39  ;;  %v1255_v42 = vmax.f32 %v1142_v40, 0.0  ;;  %v952_v43 = vpop.f32.mrb[32].mxu1 }
 0x1b0   : > { %v1145_v44 = vpop.f32.mrb[32].mxu0  ;;  %1318 = vst [vmem:[%s2349_s9 + $0xf0] sm:$0xff] %v1254_v41  ;;  %v953_v45 = vadd.f32 %v952_v43, %v2340_v5  ;;  %v954_v46 = vpop.f32.mrb[33].mxu1 }
 0x1b1   : > { %v1147_v47 = vpop.f32.mrb[33].mxu0  ;;  %1319 = vst [vmem:[%s2349_s9 + $0xf8] sm:$0xff] %v1255_v42  ;;  %v955_v48 = vadd.f32 %v954_v46, %v2342_v6  ;;  %v956_v49 = vpop.f32.mrb[34].mxu1 }
 0x1b2   : > { %v1149_v50 = vpop.f32.mrb[34].mxu0  ;;  %v1146_v51 = vadd.f32 %v1145_v44, %v953_v45  ;;  %v957_v52 = vadd.f32 %v956_v49, %v2340_v5  ;;  %v958_v53 = vpop.f32.mrb[35].mxu1 }
 0x1b3   : > { %v1151_v54 = vpop.f32.mrb[35].mxu0  ;;  %v1148_v55 = vadd.f32 %v1147_v47, %v955_v48  ;;  %v959_v56 = vadd.f32 %v958_v53, %v2342_v6 }
 0x1b4   : > { %v1256_v57 = vmax.f32 %v1146_v51, 0.0  ;;  %v1150_v58 = vadd.f32 %v1149_v50, %v957_v52 }
 0x1b5   : > { %v1257_v59 = vmax.f32 %v1148_v55, 0.0  ;;  %v1152_v60 = vadd.f32 %v1151_v54, %v959_v56 }
 0x1b6   : > { %1320 = vst [vmem:[%s2349_s9 + $0x100] sm:$0xff] %v1256_v57  ;;  %v1258_v61 = vmax.f32 %v1150_v58, 0.0 }
 0x1b7   : > { %1321 = vst [vmem:[%s2349_s9 + $0x108] sm:$0xff] %v1257_v59  ;;  %v1259_v62 = vmax.f32 %v1152_v60, 0.0  ;;  %v962_v63 = vpop.f32.mrb[36].mxu1 }
 0x1b8   : > { %v1155_v0 = vpop.f32.mrb[36].mxu0  ;;  %1322 = vst [vmem:[%s2349_s9 + $0x110] sm:$0xff] %v1258_v61  ;;  %v963_v1 = vadd.f32 %v962_v63, %v2340_v5  ;;  %v964_v2 = vpop.f32.mrb[37].mxu1 }
 0x1b9   : > { %v1157_v3 = vpop.f32.mrb[37].mxu0  ;;  %1323 = vst [vmem:[%s2349_s9 + $0x118] sm:$0xff] %v1259_v62  ;;  %v965_v4 = vadd.f32 %v964_v2, %v2342_v6  ;;  %v966_v7 = vpop.f32.mrb[38].mxu1 }
 0x1ba   : > { %v1159_v8 = vpop.f32.mrb[38].mxu0  ;;  %v1156_v9 = vadd.f32 %v1155_v0, %v963_v1  ;;  %v967_v10 = vadd.f32 %v966_v7, %v2340_v5  ;;  %v968_v11 = vpop.f32.mrb[39].mxu1 }
 0x1bb   : > { %v1161_v12 = vpop.f32.mrb[39].mxu0  ;;  %v1158_v13 = vadd.f32 %v1157_v3, %v965_v4  ;;  %v969_v14 = vadd.f32 %v968_v11, %v2342_v6 }
 0x1bc   : > { %v1260_v15 = vmax.f32 %v1156_v9, 0.0  ;;  %v1160_v16 = vadd.f32 %v1159_v8, %v967_v10 }
 0x1bd   : > { %v1261_v17 = vmax.f32 %v1158_v13, 0.0  ;;  %v1162_v18 = vadd.f32 %v1161_v12, %v969_v14 }
 0x1be   : > { %1324 = vst [vmem:[%s2349_s9 + $0x120] sm:$0xff] %v1260_v15  ;;  %v1262_v19 = vmax.f32 %v1160_v16, 0.0 }
 0x1bf   : > { %1325 = vst [vmem:[%s2349_s9 + $0x128] sm:$0xff] %v1261_v17  ;;  %v1263_v20 = vmax.f32 %v1162_v18, 0.0  ;;  %v972_v21 = vpop.f32.mrb[40].mxu1 }
 0x1c0   : > { %v1165_v22 = vpop.f32.mrb[40].mxu0  ;;  %1326 = vst [vmem:[%s2349_s9 + $0x130] sm:$0xff] %v1262_v19  ;;  %v973_v23 = vadd.f32 %v972_v21, %v2340_v5  ;;  %v974_v24 = vpop.f32.mrb[41].mxu1 }
 0x1c1   : > { %v1167_v25 = vpop.f32.mrb[41].mxu0  ;;  %1327 = vst [vmem:[%s2349_s9 + $0x138] sm:$0xff] %v1263_v20  ;;  %v975_v26 = vadd.f32 %v974_v24, %v2342_v6  ;;  %v976_v27 = vpop.f32.mrb[42].mxu1 }
 0x1c2   : > { %v1169_v28 = vpop.f32.mrb[42].mxu0  ;;  %v1166_v29 = vadd.f32 %v1165_v22, %v973_v23  ;;  %v977_v30 = vadd.f32 %v976_v27, %v2340_v5  ;;  %v978_v31 = vpop.f32.mrb[43].mxu1 }
 0x1c3   : > { %v1171_v32 = vpop.f32.mrb[43].mxu0  ;;  %v1168_v33 = vadd.f32 %v1167_v25, %v975_v26  ;;  %v979_v34 = vadd.f32 %v978_v31, %v2342_v6 }
 0x1c4   : > { %v1264_v35 = vmax.f32 %v1166_v29, 0.0  ;;  %v1170_v36 = vadd.f32 %v1169_v28, %v977_v30 }
 0x1c5   : > { %v1265_v37 = vmax.f32 %v1168_v33, 0.0  ;;  %v1172_v38 = vadd.f32 %v1171_v32, %v979_v34 }
 0x1c6   : > { %1328 = vst [vmem:[%s2349_s9 + $0x140] sm:$0xff] %v1264_v35  ;;  %v1266_v39 = vmax.f32 %v1170_v36, 0.0 }
 0x1c7   : > { %1329 = vst [vmem:[%s2349_s9 + $0x148] sm:$0xff] %v1265_v37  ;;  %v1267_v40 = vmax.f32 %v1172_v38, 0.0  ;;  %v982_v41 = vpop.f32.mrb[44].mxu1 }
 0x1c8   : > { %v1175_v42 = vpop.f32.mrb[44].mxu0  ;;  %1330 = vst [vmem:[%s2349_s9 + $0x150] sm:$0xff] %v1266_v39  ;;  %v983_v43 = vadd.f32 %v982_v41, %v2340_v5  ;;  %v984_v44 = vpop.f32.mrb[45].mxu1 }
 0x1c9   : > { %v1177_v45 = vpop.f32.mrb[45].mxu0  ;;  %1331 = vst [vmem:[%s2349_s9 + $0x158] sm:$0xff] %v1267_v40  ;;  %v985_v46 = vadd.f32 %v984_v44, %v2342_v6  ;;  %v986_v47 = vpop.f32.mrb[46].mxu1 }
 0x1ca   : > { %v1179_v48 = vpop.f32.mrb[46].mxu0  ;;  %v1176_v49 = vadd.f32 %v1175_v42, %v983_v43  ;;  %v987_v50 = vadd.f32 %v986_v47, %v2340_v5  ;;  %v988_v51 = vpop.f32.mrb[47].mxu1 }
 0x1cb   : > { %v1181_v52 = vpop.f32.mrb[47].mxu0  ;;  %v1178_v53 = vadd.f32 %v1177_v45, %v985_v46  ;;  %v989_v54 = vadd.f32 %v988_v51, %v2342_v6 }
 0x1cc   : > { %v1268_v55 = vmax.f32 %v1176_v49, 0.0  ;;  %v1180_v56 = vadd.f32 %v1179_v48, %v987_v50 }
 0x1cd   : > { %v1269_v57 = vmax.f32 %v1178_v53, 0.0  ;;  %v1182_v58 = vadd.f32 %v1181_v52, %v989_v54 }
 0x1ce   : > { %1332 = vst [vmem:[%s2349_s9 + $0x160] sm:$0xff] %v1268_v55  ;;  %v1270_v59 = vmax.f32 %v1180_v56, 0.0 }
 0x1cf   : > { %1333 = vst [vmem:[%s2349_s9 + $0x168] sm:$0xff] %v1269_v57  ;;  %v1271_v60 = vmax.f32 %v1182_v58, 0.0  ;;  %v992_v61 = vpop.f32.mrb[48].mxu1 }
 0x1d0   : > { %v1185_v62 = vpop.f32.mrb[48].mxu0  ;;  %1334 = vst [vmem:[%s2349_s9 + $0x170] sm:$0xff] %v1270_v59  ;;  %v993_v63 = vadd.f32 %v992_v61, %v2340_v5  ;;  %v994_v0 = vpop.f32.mrb[49].mxu1 }
 0x1d1   : > { %v1187_v1 = vpop.f32.mrb[49].mxu0  ;;  %1335 = vst [vmem:[%s2349_s9 + $0x178] sm:$0xff] %v1271_v60  ;;  %v995_v2 = vadd.f32 %v994_v0, %v2342_v6  ;;  %v996_v3 = vpop.f32.mrb[50].mxu1 }
 0x1d2   : > { %v1189_v4 = vpop.f32.mrb[50].mxu0  ;;  %v1186_v7 = vadd.f32 %v1185_v62, %v993_v63  ;;  %v997_v8 = vadd.f32 %v996_v3, %v2340_v5  ;;  %v998_v9 = vpop.f32.mrb[51].mxu1 }
 0x1d3   : > { %v1191_v10 = vpop.f32.mrb[51].mxu0  ;;  %v1188_v11 = vadd.f32 %v1187_v1, %v995_v2  ;;  %v999_v12 = vadd.f32 %v998_v9, %v2342_v6 }
 0x1d4   : > { %v1272_v13 = vmax.f32 %v1186_v7, 0.0  ;;  %v1190_v14 = vadd.f32 %v1189_v4, %v997_v8 }
 0x1d5   : > { %v1273_v15 = vmax.f32 %v1188_v11, 0.0  ;;  %v1192_v16 = vadd.f32 %v1191_v10, %v999_v12 }
 0x1d6   : > { %1336 = vst [vmem:[%s2349_s9 + $0x180] sm:$0xff] %v1272_v13  ;;  %v1274_v17 = vmax.f32 %v1190_v14, 0.0 }
 0x1d7   : > { %1337 = vst [vmem:[%s2349_s9 + $0x188] sm:$0xff] %v1273_v15  ;;  %v1275_v18 = vmax.f32 %v1192_v16, 0.0  ;;  %v1002_v19 = vpop.f32.mrb[52].mxu1 }
 0x1d8   : > { %v1195_v20 = vpop.f32.mrb[52].mxu0  ;;  %1338 = vst [vmem:[%s2349_s9 + $0x190] sm:$0xff] %v1274_v17  ;;  %v1003_v21 = vadd.f32 %v1002_v19, %v2340_v5  ;;  %v1004_v22 = vpop.f32.mrb[53].mxu1 }
 0x1d9   : > { %v1197_v23 = vpop.f32.mrb[53].mxu0  ;;  %1339 = vst [vmem:[%s2349_s9 + $0x198] sm:$0xff] %v1275_v18  ;;  %v1005_v24 = vadd.f32 %v1004_v22, %v2342_v6  ;;  %v1006_v25 = vpop.f32.mrb[54].mxu1 }
 0x1da   : > { %v1199_v26 = vpop.f32.mrb[54].mxu0  ;;  %v1196_v27 = vadd.f32 %v1195_v20, %v1003_v21  ;;  %v1007_v28 = vadd.f32 %v1006_v25, %v2340_v5  ;;  %v1008_v29 = vpop.f32.mrb[55].mxu1 }
 0x1db   : > { %v1201_v30 = vpop.f32.mrb[55].mxu0  ;;  %v1198_v31 = vadd.f32 %v1197_v23, %v1005_v24  ;;  %v1009_v32 = vadd.f32 %v1008_v29, %v2342_v6 }
 0x1dc   : > { %v1276_v33 = vmax.f32 %v1196_v27, 0.0  ;;  %v1200_v34 = vadd.f32 %v1199_v26, %v1007_v28 }
 0x1dd   : > { %v1277_v35 = vmax.f32 %v1198_v31, 0.0  ;;  %v1202_v36 = vadd.f32 %v1201_v30, %v1009_v32 }
 0x1de   : > { %1340 = vst [vmem:[%s2349_s9 + $0x1a0] sm:$0xff] %v1276_v33  ;;  %v1278_v37 = vmax.f32 %v1200_v34, 0.0 }
 0x1df   : > { %1341 = vst [vmem:[%s2349_s9 + $0x1a8] sm:$0xff] %v1277_v35  ;;  %v1279_v38 = vmax.f32 %v1202_v36, 0.0  ;;  %v1012_v39 = vpop.f32.mrb[56].mxu1 }
 0x1e0   : > { %v1205_v40 = vpop.f32.mrb[56].mxu0  ;;  %1342 = vst [vmem:[%s2349_s9 + $0x1b0] sm:$0xff] %v1278_v37  ;;  %v1013_v41 = vadd.f32 %v1012_v39, %v2340_v5  ;;  %v1014_v42 = vpop.f32.mrb[57].mxu1 }
 0x1e1   : > { %v1207_v43 = vpop.f32.mrb[57].mxu0  ;;  %1343 = vst [vmem:[%s2349_s9 + $0x1b8] sm:$0xff] %v1279_v38  ;;  %v1015_v44 = vadd.f32 %v1014_v42, %v2342_v6  ;;  %v1016_v45 = vpop.f32.mrb[58].mxu1 }
 0x1e2   : > { %v1209_v46 = vpop.f32.mrb[58].mxu0  ;;  %v1206_v47 = vadd.f32 %v1205_v40, %v1013_v41  ;;  %v1017_v48 = vadd.f32 %v1016_v45, %v2340_v5  ;;  %v1018_v49 = vpop.f32.mrb[59].mxu1 }
 0x1e3   : > { %v1211_v50 = vpop.f32.mrb[59].mxu0  ;;  %v1208_v51 = vadd.f32 %v1207_v43, %v1015_v44  ;;  %v1019_v52 = vadd.f32 %v1018_v49, %v2342_v6 }
 0x1e4   : > { %v1280_v53 = vmax.f32 %v1206_v47, 0.0  ;;  %v1210_v54 = vadd.f32 %v1209_v46, %v1017_v48 }
 0x1e5   : > { %v1281_v55 = vmax.f32 %v1208_v51, 0.0  ;;  %v1212_v56 = vadd.f32 %v1211_v50, %v1019_v52 }
 0x1e6   : > { %1344 = vst [vmem:[%s2349_s9 + $0x1c0] sm:$0xff] %v1280_v53  ;;  %v1282_v57 = vmax.f32 %v1210_v54, 0.0 }
 0x1e7   : > { %1345 = vst [vmem:[%s2349_s9 + $0x1c8] sm:$0xff] %v1281_v55  ;;  %v1283_v58 = vmax.f32 %v1212_v56, 0.0  ;;  %v1022_v59 = vpop.f32.mrb[60].mxu1 }
 0x1e8   : > { %v1215_v60 = vpop.f32.mrb[60].mxu0  ;;  %1346 = vst [vmem:[%s2349_s9 + $0x1d0] sm:$0xff] %v1282_v57  ;;  %v1023_v61 = vadd.f32 %v1022_v59, %v2340_v5  ;;  %v1024_v62 = vpop.f32.mrb[61].mxu1 }
 0x1e9   : > { %v1217_v63 = vpop.f32.mrb[61].mxu0  ;;  %1347 = vst [vmem:[%s2349_s9 + $0x1d8] sm:$0xff] %v1283_v58  ;;  %v1025_v0 = vadd.f32 %v1024_v62, %v2342_v6  ;;  %v1026_v1 = vpop.f32.mrb[62].mxu1 }
 0x1ea   : > { %v1219_v2 = vpop.f32.mrb[62].mxu0  ;;  %v1216_v3 = vadd.f32 %v1215_v60, %v1023_v61  ;;  %v1027_v4 = vadd.f32 %v1026_v1, %v2340_v5  ;;  %v1028_v7 = vpop.f32.mrb[63].mxu1 }
 0x1eb   : > { %v1221_v8 = vpop.f32.mrb[63].mxu0  ;;  %v1218_v9 = vadd.f32 %v1217_v63, %v1025_v0  ;;  %v1029_v10 = vadd.f32 %v1028_v7, %v2342_v6 }
 0x1ec   : > { %v1284_v11 = vmax.f32 %v1216_v3, 0.0  ;;  %v1220_v12 = vadd.f32 %v1219_v2, %v1027_v4 }
 0x1ed   : > { %v1285_v13 = vmax.f32 %v1218_v9, 0.0  ;;  %v1222_v14 = vadd.f32 %v1221_v8, %v1029_v10 }
 0x1ee   : > { %1348 = vst [vmem:[%s2349_s9 + $0x1e0] sm:$0xff] %v1284_v11  ;;  %v1286_v15 = vmax.f32 %v1220_v12, 0.0 }
 0x1ef   : > { %1349 = vst [vmem:[%s2349_s9 + $0x1e8] sm:$0xff] %v1285_v13  ;;  %v1287_v5 = vmax.f32 %v1222_v14, 0.0 }
 0x1f0   : > { %1350 = vst [vmem:[%s2349_s9 + $0x1f0] sm:$0xff] %v1286_v15 }
 0x1f1   : > { %1351 = vst [vmem:[%s2349_s9 + $0x1f8] sm:$0xff] %v1287_v5 }
 0x1f2   : > { %1939 = shalt.err (!%p1936_p5)
}
 0x1f3   : > { %s1940_s29 = scalar_lea.hbm %s2477_s7, 8192  ;;  %s1944_s20 = scalar_lea.hbm %s2534_s3, 16384 }
 0x1f4   : > { %p1941_p9 = scmp.ne.s32.totalorder %s2477_s7, %s1940_s29  ;;  %p1945_p3 = scmp.lt.u32.totalorder %s2477_s7, %s2534_s3 }
 0x1f5   : > { %p1946_p7 = scmp.lt.u32.totalorder %s1944_s20, %s1940_s29  ;;  %p1948_p4 = scmp.lt.u32.totalorder %s1940_s29, %s2477_s7 }
 0x1f6   : > { %p1942_p1 = pnand %p1941_p9, %p2139_p10 }
 0x1f7   : > { %p1947_p13 = por %p1946_p7, %p1945_p3 }
 0x1f8   : > { %p1943_p2 = pneg %p1942_p1 }
 0x1f9   : > { %p1949_p6 = por %p1948_p4, %p1947_p13 }
 0x1fb   : > { %p1950_p8 = pnand %p1949_p6, %p1943_p2 }
 0x1fd   : > { %1953 = shalt.err (!%p1950_p8)
}
 0x1fe   : > { %s2021_s9 = smov 256   ;;  %s2022_s10 = smov 16  }
 0x1ff   : > { %1699 = dma.vmem_to_hbm [thread:$0]  (%p2139_p10), %s2479_s11, 8192, %s2477_s7, %s1353_s15, %s2021_s9, %s2021_s9, %s2022_s10  }
 0x200 PF: > { %s1384_s18 = sand.u32 1, %s1992_s12   ;;  %p2552_p12 = scmp.ne.s32.totalorder %s2542_s23, 0 }
 0x201   : > { %p2553_p11 = scmp.ge.s32.totalorder %s2012_s17, 2  ;;  %s1385_s26 = scalar_lea.sflag [#allocation4], %s1384_s18 }
 0x203   : > { %p1710_p0 = pnand %p2553_p11, %p2552_p12 }
 0x205   : > { %1987 = dma.done.wait (!%p1710_p0), %s1385_s26, 8192  }
 0x206   : > { %1989 = vsyncadd (!%p1710_p0), %s1385_s26, 4294959104  ;;  %s20_s17 = sadd.s32 1, %s2012_s17   ;;  %s2554_s12 = smov %s1996_s13 }
 0x207   : > { %p17_p5 = scmp.ge.s32.totalorder %s20_s17, 4   ;;  %s2555_s13 = smov %s2000_s14 }
 0x208   : > { %s2556_s14 = smov %s2148_s5  ;;  %s2557_s15 = smov %s2008_s16 }
 0x209   : > { %s2558_s16 = smov %s2560_s28  ;;  %19 = sbr.rel (!%p17_p5) target bundleno = 7 (0x7), region = 85 }
 0x210   :  { %1390 = vsyncpa [#allocation3], 1 }
 0x211   :  { %1392 = vsyncpa [#allocation3 + $0x1], 1 }
 0x212   :  { %1393 = vsyncpa [#allocation6], 1 }
 0x213   :  { %1394 = vsyncpa [#allocation4], 1 }
 0x214   :  { %1396 = vsyncpa [#allocation4 + $0x1], 1 }

</bundles_post_ra>
